<compile_context>
chip_gen: v6e
topology: v6e:2x2x1
jax: 0.10.0
libtpu: 0.0.40
codegen_flags: <defaults>
</compile_context>

<pallas_src>
import functools

import jax
import jax.numpy as jnp
from jax.experimental import pallas as pl
from jax.experimental.pallas import tpu as pltpu

THRESH = 0.3
DECAY = 0.2
BN_EPS = 1e-5
LEAKY_SLOPE = 0.01            # nn.LeakyReLU() default negative_slope
_SPLIT_DOTS_MIN_CIN = 64      # Cin >= this -> 9 accumulating dots, else fused-K concat
_TARGET_ROWS = 1024           # target matmul M per grid step


# --------------------------------------------------------------------------------------
# Kernels
# --------------------------------------------------------------------------------------
def _conv_rows(xp_ref, w_ref, b_ref, *, H, W):
    """Fused conv+BN for one block of images: in-kernel halo taps -> MXU matmul(s).

    xp_ref : (bt, H+2, W+2, Cin)  compute dtype (zero-padded halo tile)
    w_ref  : (9*Cin, Cpad)        compute dtype (fused conv+BN weight, Cout padded to 128x)
    b_ref  : (1, Cpad)            f32
    returns (bt, H*W, Cpad) f32
    """
    bt, _, _, cin = xp_ref.shape
    cpad = w_ref.shape[-1]
    hw = H * W
    x = xp_ref[...]
    wm = w_ref[...]

    if cin >= _SPLIT_DOTS_MIN_CIN:
        # 9 accumulating dots: avoids the lane-dim concatenate relayout entirely.
        acc = jnp.zeros((bt * hw, cpad), jnp.float32)
        for k in range(9):
            kh, kw = divmod(k, 3)
            tap = x[:, kh:kh + H, kw:kw + W, :].reshape(bt * hw, cin)
            acc = acc + jnp.dot(tap, wm[k * cin:(k + 1) * cin, :],
                                preferred_element_type=jnp.float32)
    else:
        # Tiny Cin (e.g. the first layer): a single fused-K contraction is cheaper.
        taps = [x[:, kh:kh + H, kw:kw + W, :].reshape(bt * hw, cin)
                for kh in range(3) for kw in range(3)]
        patch = jnp.concatenate(taps, axis=-1)                    # (bt*H*W, 9*Cin)
        acc = jnp.dot(patch, wm, preferred_element_type=jnp.float32)

    acc = acc + b_ref[...]                                        # broadcast (1, Cpad)
    return acc.reshape(bt, hw, cpad)


def _snn2d_spike_kernel(xp_ref, w_ref, b_ref, mem_ref, spike_ref, mem_out_ref, *, H, W):
    # mem_ref / spike_ref / mem_out_ref : (bt, H*W, Cpad) f32, lane-dense.
    mem_this = _conv_rows(xp_ref, w_ref, b_ref, H=H, W=W)
    mem = mem_ref[...] + mem_this
    spiked = mem > THRESH
    spike_ref[...] = spiked.astype(spike_ref.dtype)
    # mem * decay * (1 - spike) == where(spiked, 0, mem * decay)
    mem_out_ref[...] = jnp.where(spiked, 0.0, mem * DECAY)


def _snn2d_conv_kernel(xp_ref, w_ref, b_ref, out_ref, *, H, W, leaky):
    # mixed_at_mem path: only conv+BN output (optionally LeakyReLU); membrane untouched.
    mem_this = _conv_rows(xp_ref, w_ref, b_ref, H=H, W=W)
    if leaky:
        mem_this = jnp.where(mem_this >= 0, mem_this, LEAKY_SLOPE * mem_this)
    out_ref[...] = mem_this


# --------------------------------------------------------------------------------------
# Helpers
# --------------------------------------------------------------------------------------
def _round_up(x, m):
    return ((x + m - 1) // m) * m


def fuse_conv_bn(conv_w, conv_b, gamma, beta, run_mean, run_var):
    """fuse_conv_bn_eval: w' = w * g/sqrt(v+eps); b' = (b - mu)*g/sqrt(v+eps) + beta."""
    scale = gamma / jnp.sqrt(run_var + BN_EPS)                 # (Cout,)
    w_fused = conv_w * scale[:, None, None, None]              # (Cout, Cin, 3, 3)
    b_fused = (conv_b - run_mean) * scale + beta               # (Cout,)
    return w_fused, b_fused


def prepare_fused_weights(params, compute_dtype=jnp.bfloat16):
    """One-time weight prep (hoisted out of the per-timestep call).

    Returns (w_mat, b_row): fused conv+BN weight as (9*Cin, Cpad) in compute dtype and bias
    as (1, Cpad) f32, with Cout zero-padded to a multiple of 128 for lane-dense stores.
    """
    w_fused, b_fused = fuse_conv_bn(params["conv_w"], params["conv_b"],
                                    params["bn_gamma"], params["bn_beta"],
                                    params["bn_mean"], params["bn_var"])
    cout, cin = w_fused.shape[0], w_fused.shape[1]
    cpad = _round_up(cout, 128)
    # (Cout, Cin, 3, 3) -> (kh, kw, Cin, Cout) -> (9*Cin, Cout): matches in-kernel tap order.
    w_mat = jnp.transpose(w_fused, (2, 3, 1, 0)).reshape(9 * cin, cout)
    w_mat = jnp.pad(w_mat, ((0, 0), (0, cpad - cout))).astype(compute_dtype)
    b_row = jnp.pad(b_fused, (0, cpad - cout)).reshape(1, cpad).astype(jnp.float32)
    return w_mat, b_row


def _vmem_capacity_bytes():
    try:
        info_fn = getattr(pltpu, "get_tpu_info", None)
        if info_fn is not None:
            cap = getattr(info_fn(), "vmem_capacity_bytes", None)
            if cap:
                return int(cap)
    except Exception:
        pass
    return 64 << 20            # conservative fallback (v7x); v5e/v6e have 128 MiB


def _block_bytes(bt, hp, wp, cin, hw, cpad, csize, spike_path):
    inp = bt * hp * wp * cin * csize                 # input halo tile
    wts = 9 * cin * cpad * csize + cpad * 4          # resident weights + bias
    if spike_path:
        io = bt * hw * cpad * 4 * 3                  # prev mem + spike + new mem (f32)
    else:
        io = bt * hw * cpad * 4                      # conv output (f32)
    return 2 * (inp + io) + 2 * wts                  # x2 for double-buffered pipelining


def _choose_batch_tile(n, hw, cin, cpad, hp, wp, csize, vmem_budget):
    bt = max(1, _TARGET_ROWS // max(hw, 1))          # aim for ~1k matmul rows per block
    if n >= 2:
        bt = min(bt, max(1, n // 2))                 # keep >=2 grid blocks (megacore)
    bt = max(1, min(bt, n))
    while bt > 1 and _block_bytes(bt, hp, wp, cin, hw, cpad, csize, True) > vmem_budget:
        bt -= 1
    return bt


def _compiler_params(block_bytes, vmem_cap):
    kwargs = dict(dimension_semantics=("parallel",))            # megacore sharding on v7x
    if block_bytes > 12 * 1024 * 1024:                           # only raise if tiles are big
        kwargs["vmem_limit_bytes"] = int(min(block_bytes + (8 << 20), int(0.7 * vmem_cap)))
    return pltpu.CompilerParams(**kwargs)


def _rows_to_nchw(rows, n, h, w, c):
    return jnp.transpose(rows.reshape(n, h, w, c), (0, 3, 1, 2))


# --------------------------------------------------------------------------------------
# Forward wrapper
# --------------------------------------------------------------------------------------
@functools.partial(jax.jit,
                   static_argnames=("cout", "mixed_at_mem", "is_first", "act",
                                    "compute_dtype"))
def snn_2d_forward(x_nchw, prev_mem_rows, w_mat, b_row, *, cout, mixed_at_mem=False,
                   is_first=True, act="spike", compute_dtype=jnp.bfloat16):
    """SNN_2d forward.

    x_nchw        : (N, Cin, H, W) input (PyTorch layout).
    prev_mem_rows : (N, H*W, Cpad) f32 membrane state in the kernel's padded rows layout
                    (as returned by a previous call), or None.
    w_mat, b_row  : outputs of prepare_fused_weights (hoisted weight prep).
    Returns (out_nchw, new_state):
      spike path   -> spike (N, Cout, H, W) f32, new membrane state (N, H*W, Cpad) f32.
      mixed_at_mem -> mem_this (or LeakyReLU) in NCHW f32; membrane state unchanged.
    """
    n, cin, h, w = x_nchw.shape
    cpad = w_mat.shape[-1]
    hw = h * w
    hp, wp = h + 2, w + 2
    csize = jnp.dtype(compute_dtype).itemsize

    # Cast BEFORE padding: the padded activation written to HBM is already narrow.
    x_nhwc = jnp.transpose(x_nchw, (0, 2, 3, 1)).astype(compute_dtype)
    x_pad = jnp.pad(x_nhwc, ((0, 0), (1, 1), (1, 1), (0, 0)))

    vmem_cap = _vmem_capacity_bytes()
    bt = _choose_batch_tile(n, hw, cin, cpad, hp, wp, csize, int(0.6 * vmem_cap))
    n_pad = _round_up(n, bt)
    if n_pad != n:
        x_pad = jnp.pad(x_pad, ((0, n_pad - n), (0, 0), (0, 0), (0, 0)))
    grid = (n_pad // bt,)

    x_spec = pl.BlockSpec((bt, hp, wp, cin), lambda i: (i, 0, 0, 0))
    w_spec = pl.BlockSpec((9 * cin, cpad), lambda i: (0, 0))     # resident (constant map)
    b_spec = pl.BlockSpec((1, cpad), lambda i: (0, 0))           # resident
    row_spec = pl.BlockSpec((bt, hw, cpad), lambda i: (i, 0, 0))

    if mixed_at_mem:
        blk = _block_bytes(bt, hp, wp, cin, hw, cpad, csize, spike_path=False)
        kern = functools.partial(_snn2d_conv_kernel, H=h, W=w, leaky=(act != "spike"))
        out_rows = pl.pallas_call(
            kern,
            out_shape=jax.ShapeDtypeStruct((n_pad, hw, cpad), jnp.float32),
            grid=grid,
            in_specs=[x_spec, w_spec, b_spec],
            out_specs=row_spec,
            compiler_params=_compiler_params(blk, vmem_cap),
        )(x_pad, w_mat, b_row)
        out_rows = out_rows[:n, :, :cout]
        # PyTorch returns early here without touching self.mem.
        return _rows_to_nchw(out_rows, n, h, w, cout), prev_mem_rows

    if is_first or prev_mem_rows is None:
        prev_mem_rows = jnp.zeros((n, hw, cpad), jnp.float32)
    prev_in = prev_mem_rows
    if n_pad != n:
        prev_in = jnp.pad(prev_in, ((0, n_pad - n), (0, 0), (0, 0)))

    blk = _block_bytes(bt, hp, wp, cin, hw, cpad, csize, spike_path=True)
    kern = functools.partial(_snn2d_spike_kernel, H=h, W=w)
    spike_rows, new_mem_rows = pl.pallas_call(
        kern,
        out_shape=(jax.ShapeDtypeStruct((n_pad, hw, cpad), jnp.float32),   # spike (f32)
                   jax.ShapeDtypeStruct((n_pad, hw, cpad), jnp.float32)),  # new membrane
        grid=grid,
        in_specs=[x_spec, w_spec, b_spec, row_spec],
        out_specs=(row_spec, row_spec),
        input_output_aliases={3: 1},        # prev membrane buffer reused for the new state
        compiler_params=_compiler_params(blk, vmem_cap),
    )(x_pad, w_mat, b_row, prev_in)

    if n_pad != n:
        spike_rows = spike_rows[:n]
        new_mem_rows = new_mem_rows[:n]
    spike_nchw = _rows_to_nchw(spike_rows[:, :, :cout], n, h, w, cout)
    return spike_nchw, new_mem_rows


# --------------------------------------------------------------------------------------
# Reference + demo / self-test
# --------------------------------------------------------------------------------------
def _reference_mem_this_rows(x_nchw, params, compute_dtype):
    """Pure-JAX fused conv+BN (same narrow inputs, f32 accumulation), rows layout."""
    w_fused, b_fused = fuse_conv_bn(params["conv_w"], params["conv_b"],
                                    params["bn_gamma"], params["bn_beta"],
                                    params["bn_mean"], params["bn_var"])
    n, cin, h, w = x_nchw.shape
    cout = w_fused.shape[0]
    x_nhwc = jnp.transpose(x_nchw, (0, 2, 3, 1)).astype(compute_dtype)
    w_hwio = jnp.transpose(w_fused, (2, 3, 1, 0)).astype(compute_dtype)
    y = jax.lax.conv_general_dilated(
        x_nhwc, w_hwio, window_strides=(1, 1), padding="SAME",
        dimension_numbers=("NHWC", "HWIO", "NHWC"),
        preferred_element_type=jnp.float32)
    y = y + b_fused[None, None, None, :].astype(jnp.float32)
    return y.reshape(n, h * w, cout)


def make_params(key, input_c, output_c, ksize=3):
    ks = jax.random.split(key, 6)
    fan_in = input_c * ksize * ksize
    bound = 1.0 / jnp.sqrt(fan_in)
    return {
        "conv_w": jax.random.uniform(ks[0], (output_c, input_c, ksize, ksize),
                                     jnp.float32, -bound, bound),
        "conv_b": jax.random.uniform(ks[1], (output_c,), jnp.float32, -bound, bound),
        "bn_gamma": 1.0 + 0.1 * jax.random.normal(ks[2], (output_c,), jnp.float32),
        "bn_beta": 0.1 * jax.random.normal(ks[3], (output_c,), jnp.float32),
        "bn_mean": 0.05 * jax.random.normal(ks[4], (output_c,), jnp.float32),
        "bn_var": jnp.abs(1.0 + 0.1 * jax.random.normal(ks[5], (output_c,), jnp.float32)),
    }


if __name__ == "__main__":
    key = jax.random.PRNGKey(0)
    kx, kp, kx2, kp2 = jax.random.split(key, 4)

    def to_rows(a_nchw, c):
        nn_, _, hh, ww = a_nchw.shape
        return jnp.transpose(a_nchw.astype(jnp.float32), (0, 2, 3, 1)).reshape(nn_, hh * ww, c)

    # ---------------- config A: tiny Cin (fused-K concat path) ----------------
    N, CIN, COUT, H, W = 2, 4, 8, 16, 16
    x = jax.random.normal(kx, (N, CIN, H, W), jnp.float32)
    params = make_params(kp, CIN, COUT)
    w_mat, b_row = prepare_fused_weights(params)                   # hoisted weight prep

    spike1, mem1 = snn_2d_forward(x, None, w_mat, b_row, cout=COUT, is_first=True)
    spike1, mem1 = jax.block_until_ready((spike1, mem1))
    spike2, mem2 = snn_2d_forward(x, mem1, w_mat, b_row, cout=COUT, is_first=False)
    spike2, mem2 = jax.block_until_ready((spike2, mem2))
    mem_this_out, _ = snn_2d_forward(x, None, w_mat, b_row, cout=COUT,
                                     mixed_at_mem=True, is_first=True)
    mem_this_out = jax.block_until_ready(mem_this_out)

    mem_this_ref = _reference_mem_this_rows(x, params, jnp.bfloat16)   # (N, H*W, COUT) f32

    def ref_step(prev_rows, mem_this):
        mem_acc = prev_rows + mem_this
        spk = (mem_acc > THRESH).astype(jnp.float32)
        return mem_acc, spk, mem_acc * DECAY * (1.0 - spk)

    macc1, spk_ref1, mem_ref1 = ref_step(jnp.zeros_like(mem_this_ref), mem_this_ref)
    macc2, spk_ref2, mem_ref2 = ref_step(mem_ref1, mem_this_ref)
    # Ignore threshold knife-edge elements (bf16 inputs can flip them); propagate step1 mask.
    safe1 = jnp.abs(macc1 - THRESH) > 2e-3
    safe2 = safe1 & (jnp.abs(macc2 - THRESH) > 2e-3)

    def check_step(spike_nchw, mem_rows_padded, spk_ref, mem_ref, safe, tag):
        spike_rows = to_rows(spike_nchw, COUT)
        mem_rows = mem_rows_padded[:, :, :COUT]
        assert bool(jnp.all(jnp.where(safe, spike_rows == spk_ref, True))), f"spike {tag}"
        assert bool(jnp.all(jnp.where(safe, jnp.abs(mem_rows - mem_ref) < 1e-2, True))), \
            f"mem {tag}"

    check_step(spike1, mem1, spk_ref1, mem_ref1, safe1, "A/step1")
    check_step(spike2, mem2, spk_ref2, mem_ref2, safe2, "A/step2")
    assert bool(jnp.allclose(to_rows(mem_this_out, COUT), mem_this_ref, atol=1e-2)), \
        "mem_this (mixed_at_mem) mismatch"
    assert spike1.shape == (N, COUT, H, W) and spike1.dtype == jnp.float32
    assert mem1.shape[0] == N and mem1.shape[1] == H * W
    assert bool(jnp.all(mem1[:, :, COUT:] == 0.0))                 # padded channels stay 0

    # ---------------- config B: Cin >= 64 (9-accumulating-dots path) ----------------
    N2, CIN2, COUT2, H2, W2 = 2, 64, 16, 8, 8
    x2 = jax.random.normal(kx2, (N2, CIN2, H2, W2), jnp.float32)
    params2 = make_params(kp2, CIN2, COUT2)
    w_mat2, b_row2 = prepare_fused_weights(params2)
    spk_b, mem_b = snn_2d_forward(x2, None, w_mat2, b_row2, cout=COUT2, is_first=True)
    spk_b, mem_b = jax.block_until_ready((spk_b, mem_b))

    mem_this_ref2 = _reference_mem_this_rows(x2, params2, jnp.bfloat16)
    spk_ref_b = (mem_this_ref2 > THRESH).astype(jnp.float32)
    mem_ref_b = mem_this_ref2 * DECAY * (1.0 - spk_ref_b)
    safe_b = jnp.abs(mem_this_ref2 - THRESH) > 2e-3
    spk_b_rows = to_rows(spk_b, COUT2)
    mem_b_rows = mem_b[:, :, :COUT2]
    assert bool(jnp.all(jnp.where(safe_b, spk_b_rows == spk_ref_b, True))), "spike B"
    assert bool(jnp.all(jnp.where(safe_b, jnp.abs(mem_b_rows - mem_ref_b) < 1e-2, True))), \
        "mem B"

    print("KERNEL_OK")
</pallas_src>

<mosaic_0001>
module attributes {stable_mosaic.version = 11 : i64} {
  func.func @_snn2d_spike_kernel(%arg0: i32, %arg1: memref<1x18x18x4xbf16, #tpu.memory_space<vmem>>, %arg2: memref<36x128xbf16, #tpu.memory_space<vmem>>, %arg3: memref<1x128xf32, #tpu.memory_space<vmem>>, %arg4: memref<1x256x128xf32, #tpu.memory_space<vmem>>, %arg5: memref<1x256x128xf32, #tpu.memory_space<vmem>>, %arg6: memref<1x256x128xf32, #tpu.memory_space<vmem>>) attributes {dimension_semantics = [#tpu.dimension_semantics<parallel>], iteration_bounds = array<i64: 2>, scalar_prefetch = 0 : i64, scratch_operands = 0 : i64, tpu.core_type = #tpu.core_type<tc>, window_params = [{transform_indices = @transform_0, window_bounds = array<i64: 1, 18, 18, 4>}, {pipeline_mode = #tpu.pipeline_mode<synchronous>, transform_indices = @transform_1, window_bounds = array<i64: 36, 128>}, {pipeline_mode = #tpu.pipeline_mode<synchronous>, transform_indices = @transform_2, window_bounds = array<i64: 1, 128>}, {transform_indices = @transform_3, window_bounds = array<i64: 1, 256, 128>}, {transform_indices = @transform_4, window_bounds = array<i64: 1, 256, 128>}, {transform_indices = @transform_5, window_bounds = array<i64: 1, 256, 128>}]} {
    %c0 = arith.constant 0 : index
    %c0_0 = arith.constant 0 : index
    %c0_1 = arith.constant 0 : index
    %c0_2 = arith.constant 0 : index
    %0 = vector.load %arg1[%c0, %c0_0, %c0_1, %c0_2] : memref<1x18x18x4xbf16, #tpu.memory_space<vmem>>, vector<1x18x18x4xbf16>
    %c0_3 = arith.constant 0 : index
    %c0_4 = arith.constant 0 : index
    %1 = vector.load %arg2[%c0_3, %c0_4] : memref<36x128xbf16, #tpu.memory_space<vmem>>, vector<36x128xbf16>
    %2 = vector.extract_strided_slice %0 {offsets = [0, 0, 0, 0], sizes = [1, 16, 16, 4], strides = [1, 1, 1, 1]} : vector<1x18x18x4xbf16> to vector<1x16x16x4xbf16>
    %3 = vector.shape_cast %2 : vector<1x16x16x4xbf16> to vector<256x4xbf16>
    %4 = vector.extract_strided_slice %0 {offsets = [0, 0, 1, 0], sizes = [1, 16, 16, 4], strides = [1, 1, 1, 1]} : vector<1x18x18x4xbf16> to vector<1x16x16x4xbf16>
    %5 = vector.shape_cast %4 : vector<1x16x16x4xbf16> to vector<256x4xbf16>
    %6 = vector.extract_strided_slice %0 {offsets = [0, 0, 2, 0], sizes = [1, 16, 16, 4], strides = [1, 1, 1, 1]} : vector<1x18x18x4xbf16> to vector<1x16x16x4xbf16>
    %7 = vector.shape_cast %6 : vector<1x16x16x4xbf16> to vector<256x4xbf16>
    %8 = vector.extract_strided_slice %0 {offsets = [0, 1, 0, 0], sizes = [1, 16, 16, 4], strides = [1, 1, 1, 1]} : vector<1x18x18x4xbf16> to vector<1x16x16x4xbf16>
    %9 = vector.shape_cast %8 : vector<1x16x16x4xbf16> to vector<256x4xbf16>
    %10 = vector.extract_strided_slice %0 {offsets = [0, 1, 1, 0], sizes = [1, 16, 16, 4], strides = [1, 1, 1, 1]} : vector<1x18x18x4xbf16> to vector<1x16x16x4xbf16>
    %11 = vector.shape_cast %10 : vector<1x16x16x4xbf16> to vector<256x4xbf16>
    %12 = vector.extract_strided_slice %0 {offsets = [0, 1, 2, 0], sizes = [1, 16, 16, 4], strides = [1, 1, 1, 1]} : vector<1x18x18x4xbf16> to vector<1x16x16x4xbf16>
    %13 = vector.shape_cast %12 : vector<1x16x16x4xbf16> to vector<256x4xbf16>
    %14 = vector.extract_strided_slice %0 {offsets = [0, 2, 0, 0], sizes = [1, 16, 16, 4], strides = [1, 1, 1, 1]} : vector<1x18x18x4xbf16> to vector<1x16x16x4xbf16>
    %15 = vector.shape_cast %14 : vector<1x16x16x4xbf16> to vector<256x4xbf16>
    %16 = vector.extract_strided_slice %0 {offsets = [0, 2, 1, 0], sizes = [1, 16, 16, 4], strides = [1, 1, 1, 1]} : vector<1x18x18x4xbf16> to vector<1x16x16x4xbf16>
    %17 = vector.shape_cast %16 : vector<1x16x16x4xbf16> to vector<256x4xbf16>
    %18 = vector.extract_strided_slice %0 {offsets = [0, 2, 2, 0], sizes = [1, 16, 16, 4], strides = [1, 1, 1, 1]} : vector<1x18x18x4xbf16> to vector<1x16x16x4xbf16>
    %19 = vector.shape_cast %18 : vector<1x16x16x4xbf16> to vector<256x4xbf16>
    %20 = tpu.concatenate %3, %5, %7, %9, %11, %13, %15, %17, %19 in 1 : vector<256x4xbf16>, vector<256x4xbf16>, vector<256x4xbf16>, vector<256x4xbf16>, vector<256x4xbf16>, vector<256x4xbf16>, vector<256x4xbf16>, vector<256x4xbf16>, vector<256x4xbf16> -> vector<256x36xbf16>
    %cst = arith.constant dense<0.000000e+00> : vector<256x128xf32>
    %21 = tpu.matmul %20, %1, %cst {dimension_numbers = #tpu.dot_dimension_numbers<[1], [0], [0], [1], [0, 0, 1, 1], [], []>} : vector<256x36xbf16>, vector<36x128xbf16>, vector<256x128xf32> -> vector<256x128xf32>
    %c0_5 = arith.constant 0 : index
    %c0_6 = arith.constant 0 : index
    %22 = vector.load %arg3[%c0_5, %c0_6] : memref<1x128xf32, #tpu.memory_space<vmem>>, vector<1x128xf32>
    %23 = vector.broadcast %22 : vector<1x128xf32> to vector<256x128xf32>
    %24 = arith.addf %21, %23 : vector<256x128xf32>
    %25 = vector.shape_cast %24 : vector<256x128xf32> to vector<1x256x128xf32>
    %c0_7 = arith.constant 0 : index
    %c0_8 = arith.constant 0 : index
    %c0_9 = arith.constant 0 : index
    %26 = vector.load %arg4[%c0_7, %c0_8, %c0_9] : memref<1x256x128xf32, #tpu.memory_space<vmem>>, vector<1x256x128xf32>
    %27 = arith.addf %26, %25 : vector<1x256x128xf32>
    %cst_10 = arith.constant 3.000000e-01 : f32
    %28 = vector.broadcast %cst_10 : f32 to vector<1x256x128xf32>
    %29 = arith.cmpf ogt, %27, %28 : vector<1x256x128xf32>
    %30 = arith.extui %29 : vector<1x256x128xi1> to vector<1x256x128xi32>
    %31 = arith.sitofp %30 : vector<1x256x128xi32> to vector<1x256x128xf32>
    %c0_11 = arith.constant 0 : index
    %c0_12 = arith.constant 0 : index
    %c0_13 = arith.constant 0 : index
    %32 = vector.load %arg5[%c0_11, %c0_12, %c0_13] : memref<1x256x128xf32, #tpu.memory_space<vmem>>, vector<1x256x128xf32>
    tpu.vector_store %arg5[%c0_11, %c0_12, %c0_13], %31 {strides = array<i32>} : memref<1x256x128xf32, #tpu.memory_space<vmem>>, vector<1x256x128xf32>,
    %cst_14 = arith.constant 2.000000e-01 : f32
    %33 = vector.broadcast %cst_14 : f32 to vector<1x256x128xf32>
    %34 = arith.mulf %27, %33 : vector<1x256x128xf32>
    %cst_15 = arith.constant 0.000000e+00 : f32
    %35 = vector.broadcast %cst_15 : f32 to vector<1x256x128xf32>
    %36 = arith.select %29, %35, %34 : vector<1x256x128xi1>, vector<1x256x128xf32>
    %c0_16 = arith.constant 0 : index
    %c0_17 = arith.constant 0 : index
    %c0_18 = arith.constant 0 : index
    %37 = vector.load %arg6[%c0_16, %c0_17, %c0_18] : memref<1x256x128xf32, #tpu.memory_space<vmem>>, vector<1x256x128xf32>
    tpu.vector_store %arg6[%c0_16, %c0_17, %c0_18], %36 {strides = array<i32>} : memref<1x256x128xf32, #tpu.memory_space<vmem>>, vector<1x256x128xf32>,
    return
  }
  func.func @transform_0(%arg0: i32) -> (i32, i32, i32, i32) {
    %c0_i32 = arith.constant 0 : i32
    %c0_i32_0 = arith.constant 0 : i32
    %c0_i32_1 = arith.constant 0 : i32
    %c0_i32_2 = arith.constant 0 : i32
    return %arg0, %c0_i32, %c0_i32_0, %c0_i32_1 : i32, i32, i32, i32
  }
  func.func @transform_1(%arg0: i32) -> (i32, i32) {
    %c0_i32 = arith.constant 0 : i32
    %c0_i32_0 = arith.constant 0 : i32
    %c0_i32_1 = arith.constant 0 : i32
    return %c0_i32, %c0_i32_0 : i32, i32
  }
  func.func @transform_2(%arg0: i32) -> (i32, i32) {
    %c0_i32 = arith.constant 0 : i32
    %c0_i32_0 = arith.constant 0 : i32
    %c0_i32_1 = arith.constant 0 : i32
    return %c0_i32, %c0_i32_0 : i32, i32
  }
  func.func @transform_3(%arg0: i32) -> (i32, i32, i32) {
    %c0_i32 = arith.constant 0 : i32
    %c0_i32_0 = arith.constant 0 : i32
    %c0_i32_1 = arith.constant 0 : i32
    return %arg0, %c0_i32, %c0_i32_0 : i32, i32, i32
  }
  func.func @transform_4(%arg0: i32) -> (i32, i32, i32) {
    %c0_i32 = arith.constant 0 : i32
    %c0_i32_0 = arith.constant 0 : i32
    %c0_i32_1 = arith.constant 0 : i32
    return %arg0, %c0_i32, %c0_i32_0 : i32, i32, i32
  }
  func.func @transform_5(%arg0: i32) -> (i32, i32, i32) {
    %c0_i32 = arith.constant 0 : i32
    %c0_i32_0 = arith.constant 0 : i32
    %c0_i32_1 = arith.constant 0 : i32
    return %arg0, %c0_i32, %c0_i32_0 : i32, i32, i32
  }
}

</mosaic_0001>

<bundles_post_ra>
// kernel: snn_2d_forward.1
= control target key start
LH: loop header
LB: loop body
LE: loop exit
PB: predicated region body
PF: predicated region fallthrough
CT: control target
= control target key end

     0   :  { %s2534_s18 = smov 0   ;;  %s3911_s0 = inlined_call_operand.vmem [shape: bf16[2,18,18,4], index: 0, kind: input, shape index: {}]   ;;  %s3912_s1 = inlined_call_operand.vmem [shape: bf16[36,128], index: 1, kind: input, shape index: {}]   ;;  %s3913_s2 = inlined_call_operand.vmem [shape: f32[1,128], index: 2, kind: input, shape index: {}]   ;;  %s3914_s3 = inlined_call_operand.vmem [shape: f32[2,256,128], index: 3, kind: input, shape index: {}, may-alias: {3,5}]   ;;  %s3915_s4 = inlined_call_operand.vmem [shape: f32[2,256,128], index: 4, kind: output, shape index: {0}]   ;;  %s3916_s5 = inlined_call_operand.vmem [shape: f32[2,256,128], index: 5, kind: output, shape index: {1}, may-alias: {3,5}]  }
   0x1 LB: > { %s2242_s19 = sadd.s32 4294967295, %s2493_s18   ;;  %p2246_p0 = scmp.ge.s32.totalorder %s2493_s18, 1  ;;  %s2493_s18 = sphi %s2534_s18, %s16_s18  }
   0x2   : > { %p200_p1 = scmp.lt.s32.totalorder %s2493_s18, 3 }
   0x4   : > { %p201_p2 = pnand %p2246_p0, %p200_p1 }
   0x6   : > { %204 = sbr.rel (%p201_p2) target bundleno = 611 (0x263), region = 36 }
   0xb   : > { %p238_p3 = scmp.lt.s32.totalorder %s2242_s19, 1  ;;  %vm753_vm0 = vcmask 1042432   ;;  %vm754_vm1 = vcmask 1046532   ;;  %vm318_vm2 = vsmask.f32 3328  ;;  %s2495_s24 = smov 12  }
   0xc   : > { %vm319_vm3 = vsmask.f32 7440  ;;  %vm2580_vm4 = vmor %vm753_vm0, %vm754_vm1  ;;  %s2496_s25 = smov 8   ;;  %s2497_s26 = smov 4   ;;  %vm1689_vm6 = vcmask 1041408   ;;  %vm1354_vm7 = vcmask 31744  }
   0xd   : > { %s3943_s19 = smov (!%p238_p3, %s2242_s19), 1  ;;  %vm2625_vm5 = vmor %vm318_vm2, %vm319_vm3  ;;  %s2498_s27 = smov 16   ;;  %vm1403_vm8 = vcmask 64512   ;;  %vm1436_vm9 = vcmask 97280   ;;  %vm1469_vm10 = vcmask 130048   ;;  %vm1502_vm11 = vcmask 162816  }
   0xe   : > { %s2448_s20 = smul.u32 216, %s3943_s19  ;;  %s2499_s28 = smov 20   ;;  %vm1535_vm12 = vcmask 195584   ;;  %vm1568_vm13 = vcmask 228352   ;;  %vm1601_vm14 = vcmask 261120   ;;  %vm1656_vm15 = vcmask 293888  }
   0xf   : > { %s2500_s29 = smov 24   ;;  %s2501_s30 = smov 28  }
  0x10   : > { %s2548_s23 = scalar_lea.vmem %s3911_s0, %s2448_s20  ;;  %s2502_s6 = smov 32  }
  0x11   : > { %v2551_v0 = vld [vmem:[%s2548_s23 + $0x6c] sm:$0xf]  ;;  %v2554_v1 = vld [vmem:[%s2548_s23 + $0x70] sm:$0xf]  ;;  %v2568_v12 = vld [vmem:[%s2548_s23 + $0x60] sm:$0xf] }
  0x12   : > { %v262_v2 = vld [vmem:[%s2548_s23 + $0xc] sm:$0xf]  ;;  %v551_v3 = vshrl.u32 %v2554_v1, 16  ;;  %v2560_v4 = vcombine.low %v2551_v0, %v2554_v1  ;;  %v538_v5 = vshrl.u32 %v2551_v0, 16  ;;  %v541_v6 = vshll.u32 %v2551_v0, 16  ;;  %s3628_s13 = sshll.u32 %s3943_s19, 8 }
  0x13   : > { %v263_v7 = vld [vmem:[%s2548_s23 + $0x10] sm:$0xf]  ;;  %v346_v11 = vshrl.u32 %v262_v2, 16  ;;  %v349_v13 = vshll.u32 %v262_v2, 16  ;;  %v2573_v14 = vld [vmem:[%s2548_s23 + $0x64] sm:$0xf]  ;;  %s3643_s16 = scalar_lea.vmem %s3914_s3, %s3628_s13  ;;  %s3731_s22 = scalar_lea.vmem %s3915_s4, %s3628_s13 }
  0x14   : > { %v355_v8 = vshll.u32 %v263_v7, 16  ;;  %v359_v9 = vshrl.u32 %v263_v7, 16  ;;  %v2565_v10 = vcombine.low %v262_v2, %v263_v7  ;;  %1163 = vrot.lane.b32.xlu1 %v2560_v4, %s2495_s24  ;;  %v2576_v15 = vld [vmem:[%s2548_s23 + $0x68] sm:$0x1]  ;;  %v2262_v17 = vrot.slane %v2568_v12, 9 }
  0x15   : > { %v348_v19 = vrot.slane %v346_v11, 4  ;;  %v814_v20 = vrot.slane %v2573_v14, 5  ;;  %v817_v21 = vrot.slane %v2576_v15, 5  ;;  %v2590_v22 = vld [vmem:[%s2548_s23] sm:$0xf]  ;;  %v351_v23 = vrot.slane %v349_v13, 5 }
  0x16   : > { %v361_v18 = vrot.slane %v359_v9, 4  ;;  %1147 = vrot.lane.b32.xlu0 %v2565_v10, %s2495_s24  ;;  %v2593_v24 = vld [vmem:[%s2548_s23 + $0x4] sm:$0xf]  ;;  %v261_v25 = vld [vmem:[%s2548_s23 + $0x8] sm:$0x1]  ;;  %v2254_v26 = vrot.slane %v2590_v22, 9 }
  0x17   : > { %v815_v27 = vsel %vm2580_vm4, %v2262_v17, %v814_v20  ;;  %v816_v28 = vrot.slane %v814_v20, 4  ;;  %v758_v29 = vrot.slane %v2593_v24, 5  ;;  %v761_v30 = vrot.slane %v261_v25, 5  ;;  %v2601_v31 = vld [vmem:[%s2548_s23 + $0x74] sm:$0x1] }
  0x18   : > { %v2263_v32 = vrot.slane %v2551_v0, 9  ;;  %v821_v33 = vrot.slane %v2554_v1, 5  ;;  %v824_v34 = vrot.slane %v2601_v31, 5  ;;  %v264_v35 = vld [vmem:[%s2548_s23 + $0x14] sm:$0x1]  ;;  %v2255_v36 = vrot.slane %v262_v2, 9 }
  0x19   : > { %v818_v37 = vsel %vm2580_vm4, %v816_v28, %v817_v21  ;;  %v759_v38 = vsel %vm2580_vm4, %v2254_v26, %v758_v29  ;;  %v760_v39 = vrot.slane %v758_v29, 4  ;;  %v765_v40 = vrot.slane %v263_v7, 5 }
  0x1a   : > { %v2611_v41 = vcombine.low %v815_v27, %v818_v37  ;;  %v822_v42 = vsel %vm2580_vm4, %v2263_v32, %v821_v33  ;;  %v823_v43 = vrot.slane %v821_v33, 4  ;;  %v768_v44 = vrot.slane %v264_v35, 5 }
  0x1b   : > { %v762_v45 = vsel %vm2580_vm4, %v760_v39, %v761_v30  ;;  %v766_v46 = vsel %vm2580_vm4, %v2255_v36, %v765_v40  ;;  %v767_v47 = vrot.slane %v765_v40, 4  ;;  %v352_v48 = vor.u32 %v351_v23, %v348_v19  ;;  %v2669_v39 = vld [vmem:[%s2548_s23 + $0x7c] sm:$0xf] }
  0x1c   : > { %1128 = vrot.lane.b32.xlu1 %v2611_v41, %s2496_s25  ;;  %v2304_v49 = vcombine.low %v759_v38, %v762_v45  ;;  %v825_v50 = vsel %vm2580_vm4, %v823_v43, %v824_v34  ;;  %v357_v52 = vrot.slane %v355_v8, 5  ;;  %v365_v53 = vshll.u32 %v264_v35, 16  ;;  %v2664_v35 = vld [vmem:[%s2548_s23 + $0x78] sm:$0xf] }
  0x1d   : > { %v2629_v54 = vcombine.low %v822_v42, %v825_v50  ;;  %v769_v55 = vsel %vm2580_vm4, %v767_v47, %v768_v44  ;;  %v353_v56 = vrot.slane %v352_v48, 4  ;;  %v322_v57 = vshrl.u32 %v2590_v22, 16  ;;  %v2681_v50 = vld [vmem:[%s2548_s23 + $0x1c] sm:$0xf] }
  0x1e   : > { %1112 = vrot.lane.b32.xlu0 %v2304_v49, %s2496_s25  ;;  %v2635_v58 = vcombine.low %v766_v46, %v769_v55  ;;  %v362_v59 = vor.u32 %v361_v18, %v357_v52  ;;  %v367_v60 = vrot.slane %v365_v53, 5  ;;  %v325_v61 = vshll.u32 %v2590_v22, 16  ;;  %v2678_v49 = vld [vmem:[%s2548_s23 + $0x18] sm:$0xf] }
  0x1f   : > { %3928 = vst [vmem:[#allocation2_spill] sm:$0xff] %v2629_v54  ;;  %v358_v62 = vsel %vm2625_vm5, %v353_v56, %v357_v52  ;;  %v324_v63 = vrot.slane %v322_v57, 4  ;;  %v331_v2 = vshll.u32 %v2593_v24, 16  ;;  %v335_v7 = vshrl.u32 %v2593_v24, 16 }
  0x20   : > { %1130 = vrot.lane.b32.xlu1 %v2629_v54, %s2496_s25  ;;  %v363_v8 = vrot.slane %v362_v59, 4  ;;  %v327_v9 = vrot.slane %v325_v61, 5  ;;  %v341_v11 = vshll.u32 %v261_v25, 16  ;;  %v540_v13 = vrot.slane %v538_v5, 4 }
  0x21   : > { %v333_v17 = vrot.slane %v331_v2, 5  ;;  %v337_v18 = vrot.slane %v335_v7, 4  ;;  %v543_v19 = vrot.slane %v541_v6, 5  ;;  %v547_v20 = vshll.u32 %v2554_v1, 16 }
  0x22   : > { %1114 = vrot.lane.b32.xlu0 %v2635_v58, %s2496_s25  ;;  %v368_v21 = vsel %vm2625_vm5, %v363_v8, %v367_v60  ;;  %v328_v23 = vor.u32 %v327_v9, %v324_v63  ;;  %v343_v26 = vrot.slane %v341_v11, 5  ;;  %v553_v25 = vrot.slane %v551_v3, 4  ;;  %v291_v60 = vld [vmem:[%s2548_s23 + $0x80] sm:$0x1] }
  0x23   : > { %v2655_v5 = vcombine.low %v358_v62, %v368_v21  ;;  %v338_v27 = vor.u32 %v337_v18, %v333_v17  ;;  %v544_v28 = vor.u32 %v543_v19, %v540_v13  ;;  %v549_v0 = vrot.slane %v547_v20, 5  ;;  %v2705_v20 = vld [vmem:[%s2548_s23 + $0x20] sm:$0x1] }
  0x24   : > { %v329_v6 = vrot.slane %v328_v23, 4  ;;  %v557_v29 = vshll.u32 %v2601_v31, 16  ;;  %v514_v30 = vshrl.u32 %v2568_v12, 16  ;;  %v517_v32 = vshll.u32 %v2568_v12, 16 }
  0x25   : > { %1034 = vrot.lane.b32.xlu1 %v2655_v5, %s2497_s26  ;;  %v339_v1 = vrot.slane %v338_v27, 4  ;;  %v545_v33 = vrot.slane %v544_v28, 4  ;;  %v554_v3 = vor.u32 %v553_v25, %v549_v0  ;;  %v523_v34 = vshll.u32 %v2573_v14, 16 }
  0x26   : > { %v334_v31 = vsel %vm2625_vm5, %v329_v6, %v333_v17  ;;  %v559_v36 = vrot.slane %v557_v29, 5  ;;  %v516_v37 = vrot.slane %v514_v30, 4  ;;  %v519_v38 = vrot.slane %v517_v32, 5 }
  0x27   : > { %v344_v40 = vsel %vm2625_vm5, %v339_v1, %v343_v26  ;;  %v550_v42 = vsel %vm2625_vm5, %v545_v33, %v549_v0  ;;  %v555_v43 = vrot.slane %v554_v3, 4  ;;  %v525_v44 = vrot.slane %v523_v34, 5 }
  0x28   : > { %v2288_v45 = vcombine.low %v334_v31, %v344_v40  ;;  %v520_v46 = vor.u32 %v519_v38, %v516_v37  ;;  %v527_v47 = vshrl.u32 %v2573_v14, 16  ;;  %v533_v48 = vshll.u32 %v2576_v15, 16 }
  0x29   : > { %v560_v52 = vsel %vm2625_vm5, %v555_v43, %v559_v36  ;;  %v562_v53 = vshrl.u32 %v2664_v35, 16  ;;  %v565_v55 = vshll.u32 %v2664_v35, 16  ;;  %v575_v56 = vshrl.u32 %v2669_v39, 16 }
  0x2a   : > { %1032 = vrot.lane.b32.xlu0 %v2288_v45, %s2497_s26  ;;  %v2689_v57 = vcombine.low %v550_v42, %v560_v52  ;;  %v521_v59 = vrot.slane %v520_v46, 4  ;;  %v529_v15 = vrot.slane %v527_v47, 4  ;;  %v535_v61 = vrot.slane %v533_v48, 5  ;;  %v2732_v52 = vld [vmem:[%s2548_s23 + $0x84] sm:$0xf] }
  0x2b   : > { %v370_v62 = vshrl.u32 %v2678_v49, 16  ;;  %v373_v63 = vshll.u32 %v2678_v49, 16  ;;  %v383_v2 = vshrl.u32 %v2681_v50, 16  ;;  %v2701_v9 = vcombine.low %v2664_v35, %v2669_v39 }
  0x2c   : > { %3929 = vst [vmem:[#allocation3_spill] sm:$0xff] %v2689_v57  ;;  %1050 = vrot.lane.b32.xlu1 %v2689_v57, %s2497_s26  ;;  %v526_v7 = vsel %vm2625_vm5, %v521_v59, %v525_v44  ;;  %v530_v8 = vor.u32 %v529_v15, %v525_v44  ;;  %v564_v11 = vrot.slane %v562_v53, 4  ;;  %v567_v13 = vrot.slane %v565_v55, 5  ;;  %v2735_v53 = vld [vmem:[%s2548_s23 + $0x88] sm:$0xf] }
  0x2d   : > { %v571_v17 = vshll.u32 %v2669_v39, 16  ;;  %v577_v18 = vrot.slane %v575_v56, 4  ;;  %v581_v19 = vshll.u32 %v291_v60, 16  ;;  %v372_v23 = vrot.slane %v370_v62, 4 }
  0x2e   : > { %v531_v21 = vrot.slane %v530_v8, 4  ;;  %v375_v26 = vrot.slane %v373_v63, 5  ;;  %v379_v25 = vshll.u32 %v2681_v50, 16  ;;  %v568_v27 = vor.u32 %v567_v13, %v564_v11  ;;  %v2765_v13 = vld [vmem:[%s2548_s23 + $0x24] sm:$0xf] }
  0x2f   : > { %v573_v28 = vrot.slane %v571_v17, 5  ;;  %v385_v0 = vrot.slane %v383_v2, 4  ;;  %v389_v32 = vshll.u32 %v2705_v20, 16  ;;  %v583_v34 = vrot.slane %v581_v19, 5  ;;  %v2768_v17 = vld [vmem:[%s2548_s23 + $0x28] sm:$0xf] }
  0x30   : > { %v536_v6 = vsel %vm2625_vm5, %v531_v21, %v535_v61  ;;  %1165 = vrot.lane.b32.xlu1 %v2701_v9, %s2495_s24  ;;  %v376_v29 = vor.u32 %v375_v26, %v372_v23  ;;  %v381_v30 = vrot.slane %v379_v25, 5  ;;  %v569_v33 = vrot.slane %v568_v27, 4  ;;  %v294_v23 = vld [vmem:[%s2548_s23 + $0x8c] sm:$0x1] }
  0x31   : > { %v2713_v1 = vcombine.low %v526_v7, %v536_v6  ;;  %v578_v3 = vor.u32 %v577_v18, %v573_v28  ;;  %v828_v36 = vrot.slane %v2669_v39, 5  ;;  %v2720_v37 = vcombine.low %v2678_v49, %v2681_v50 }
  0x32   : > { %v386_v31 = vor.u32 %v385_v0, %v381_v30  ;;  %v574_v38 = vsel %vm2625_vm5, %v569_v33, %v573_v28  ;;  %v377_v42 = vrot.slane %v376_v29, 4  ;;  %v391_v44 = vrot.slane %v389_v32, 5 }
  0x33   : > { %1048 = vrot.lane.b32.xlu0 %v2713_v1, %s2497_s26  ;;  %v579_v40 = vrot.slane %v578_v3, 4  ;;  %v2264_v39 = vrot.slane %v2664_v35, 9  ;;  %v830_v46 = vrot.slane %v828_v36, 4  ;;  %v831_v47 = vrot.slane %v291_v60, 5 }
  0x34   : > { %1198 = vrot.lane.b32.xlu1 %v2689_v57, %s2498_s27  ;;  %v387_v43 = vrot.slane %v386_v31, 4  ;;  %v382_v35 = vsel %vm2625_vm5, %v377_v42, %v381_v30  ;;  %v772_v59 = vrot.slane %v2681_v50, 5  ;;  %v586_v60 = vshrl.u32 %v2732_v52, 16  ;;  %v270_v42 = vld [vmem:[%s2548_s23 + $0x2c] sm:$0x1] }
  0x35   : > { %v584_v45 = vsel %vm2625_vm5, %v579_v40, %v583_v34  ;;  %v829_v56 = vsel %vm2580_vm4, %v2264_v39, %v828_v36  ;;  %v832_v15 = vsel %vm2580_vm4, %v830_v46, %v831_v47  ;;  %v589_v61 = vshll.u32 %v2732_v52, 16 }
  0x36   : > { %v2729_v48 = vcombine.low %v574_v38, %v584_v45  ;;  %v392_v55 = vsel %vm2625_vm5, %v387_v43, %v391_v44  ;;  %v599_v62 = vshrl.u32 %v2735_v53, 16  ;;  %v595_v63 = vshll.u32 %v2735_v53, 16 }
  0x37   : > { %1149 = vrot.lane.b32.xlu0 %v2720_v37, %s2495_s24  ;;  %v2756_v2 = vcombine.low %v382_v35, %v392_v55  ;;  %v2256_v7 = vrot.slane %v2678_v49, 9  ;;  %v2761_v50 = vcombine.low %v829_v56, %v832_v15  ;;  %v774_v8 = vrot.slane %v772_v59, 4 }
  0x38   : > { %1200 = vrot.lane.b32.xlu1 %v2729_v48, %s2498_s27  ;;  %v775_v11 = vrot.slane %v2705_v20, 5  ;;  %v588_v18 = vrot.slane %v586_v60, 4  ;;  %v591_v19 = vrot.slane %v589_v61, 5  ;;  %v601_v21 = vrot.slane %v599_v62, 4 }
  0x39   : > { %v773_v49 = vsel %vm2580_vm4, %v2256_v7, %v772_v59  ;;  %v394_v26 = vshrl.u32 %v2765_v13, 16  ;;  %v397_v25 = vshll.u32 %v2765_v13, 16  ;;  %v407_v27 = vshrl.u32 %v2768_v17, 16 }
  0x3a   : > { %v776_v20 = vsel %vm2580_vm4, %v774_v8, %v775_v11  ;;  %v403_v28 = vshll.u32 %v2768_v17, 16  ;;  %v592_v0 = vor.u32 %v591_v19, %v588_v18  ;;  %v605_v29 = vshll.u32 %v294_v23, 16 }
  0x3b   : > { %1182 = vrot.lane.b32.xlu0 %v2655_v5, %s2498_s27  ;;  %v597_v5 = vrot.slane %v595_v63, 5  ;;  %v2785_v30 = vcombine.low %v773_v49, %v776_v20  ;;  %v2789_v32 = vcombine.low %v2732_v52, %v2735_v53  ;;  %v396_v33 = vrot.slane %v394_v26, 4 }
  0x3c   : > { %1233 = vrot.lane.b32.xlu1 %v2629_v54, %s2499_s28  ;;  %v399_v3 = vrot.slane %v397_v25, 5  ;;  %v405_v34 = vrot.slane %v403_v28, 5  ;;  %v409_v31 = vrot.slane %v407_v27, 4  ;;  %v593_v36 = vrot.slane %v592_v0, 4  ;;  %v2872_v27 = vld [vmem:[%s2548_s23 + $0x34] sm:$0xf] }
  0x3d   : > { %v602_v6 = vor.u32 %v601_v21, %v597_v5  ;;  %v607_v40 = vrot.slane %v605_v29, 5  ;;  %v413_v44 = vshll.u32 %v270_v42, 16  ;;  %v2806_v46 = vcombine.low %v2765_v13, %v2768_v17  ;;  %v2849_v21 = vld [vmem:[%s2548_s23 + $0x90] sm:$0xf] }
  0x3e   : > { %v410_v43 = vor.u32 %v409_v31, %v405_v34  ;;  %v598_v39 = vsel %vm2625_vm5, %v593_v36, %v597_v5  ;;  %v835_v59 = vrot.slane %v2735_v53, 5  ;;  %v2265_v61 = vrot.slane %v2732_v52, 9 }
  0x3f   : > { %1184 = vrot.lane.b32.xlu0 %v2756_v2, %s2498_s27  ;;  %v603_v38 = vrot.slane %v602_v6, 4  ;;  %3930 = vst [vmem:[#allocation4_spill] sm:$0xff] %v2806_v46  ;;  %v415_v56 = vrot.slane %v413_v44, 5  ;;  %v838_v63 = vrot.slane %v294_v23, 5  ;;  %v779_v7 = vrot.slane %v2768_v17, 5 }
  0x40   : > { %1235 = vrot.lane.b32.xlu1 %v2761_v50, %s2499_s28  ;;  %v411_v55 = vrot.slane %v410_v43, 4  ;;  %v837_v62 = vrot.slane %v835_v59, 4  ;;  %v836_v8 = vsel %vm2580_vm4, %v2265_v61, %v835_v59  ;;  %v2257_v18 = vrot.slane %v2765_v13, 9  ;;  %v2852_v23 = vld [vmem:[%s2548_s23 + $0x94] sm:$0xf] }
  0x41   : > { %v608_v45 = vsel %vm2625_vm5, %v603_v38, %v607_v40  ;;  %v781_v19 = vrot.slane %v779_v7, 4  ;;  %v782_v5 = vrot.slane %v270_v42, 5  ;;  %v610_v49 = vshrl.u32 %v2849_v21, 16 }
  0x42   : > { %v2810_v47 = vcombine.low %v598_v39, %v608_v45  ;;  %v416_v60 = vsel %vm2625_vm5, %v411_v55, %v415_v56  ;;  %v839_v52 = vsel %vm2580_vm4, %v837_v62, %v838_v63  ;;  %v780_v17 = vsel %vm2580_vm4, %v2257_v18, %v779_v7 }
  0x43   : > { %1217 = vrot.lane.b32.xlu0 %v2635_v58, %s2499_s28  ;;  %v400_v58 = vor.u32 %v399_v3, %v396_v33  ;;  %v2837_v11 = vcombine.low %v836_v8, %v839_v52  ;;  %v613_v26 = vshll.u32 %v2849_v21, 16  ;;  %v623_v20 = vshrl.u32 %v2852_v23, 16  ;;  %v2875_v33 = vld [vmem:[%s2548_s23 + $0x98] sm:$0x1] }
  0x44   : > { %1268 = vrot.lane.b32.xlu1 %v2701_v9, %s2500_s29  ;;  %v619_v25 = vshll.u32 %v2852_v23, 16  ;;  %v612_v28 = vrot.slane %v610_v49, 4  ;;  %v2480_v3 = vld [vmem:[%s3912_s1 + $0x10] ss:$0 sps:$4 sm:$0x33]   ;;  %v431_v31 = vshrl.u32 %v2872_v27, 16  ;;  %v2896_v43 = vcombine.low %v2849_v21, %v2852_v23 }
  0x45   : > { %v401_v35 = vrot.slane %v400_v58, 4  ;;  %v615_v0 = vrot.slane %v613_v26, 5  ;;  %v625_v29 = vrot.slane %v623_v20, 4  ;;  %v427_v36 = vshll.u32 %v2872_v27, 16  ;;  %v2481_v58 = vld [vmem:[%s3912_s1 + $0x8] sm:$0xff]   ;;  %2446 = vmatprep.subr.msk.bf16.mxu0 %vm1689_vm6, %v2480_v3  ;;  %2447 = vmatprep.subr.msk.bf16.mxu1 %vm1689_vm6, %v2480_v3 }
  0x46   : > { %v621_v6 = vrot.slane %v619_v25, 5  ;;  %v629_v42 = vshll.u32 %v2875_v33, 16  ;;  %3931 = vst [vmem:[#allocation5_spill] sm:$0xff] %v2896_v43  ;;  %v1691_v44 = vsel %vm1689_vm6, %v2480_v3, 0  ;;  %v433_v55 = vrot.slane %v431_v31, 4 }
  0x47   : > { %1219 = vrot.lane.b32.xlu0 %v2785_v30, %s2499_s28  ;;  %v406_v15 = vsel %vm2625_vm5, %v401_v35, %v405_v34  ;;  %v616_v38 = vor.u32 %v615_v0, %v612_v28  ;;  %v429_v35 = vrot.slane %v427_v36, 5  ;;  %2403 = vmatpush3.bf16.msra.mxu0 %v1691_v44  ;;  %v842_v52 = vrot.slane %v2852_v23, 5  ;;  %v2926_v20 = vld [vmem:[%s2548_s23 + $0x9c] sm:$0xf]  ;;  %v2929_v25 = vld [vmem:[%s2548_s23 + $0xa0] sm:$0xf] }
  0x48   : > { %1270 = vrot.lane.b32.xlu1 %v2789_v32, %s2500_s29  ;;  %v2824_v53 = vcombine.low %v406_v15, %v416_v60  ;;  %v626_v40 = vor.u32 %v625_v29, %v621_v6  ;;  %v631_v15 = vrot.slane %v629_v42, 5  ;;  %v273_v60 = vld [vmem:[%s2548_s23 + $0x38] sm:$0x1]  ;;  %2443 = vmatpush3.bf16.msra.mxu1 %v1691_v44  ;;  %v845_v26 = vrot.slane %v2875_v33, 5  ;;  %v2961_v42 = vld [vmem:[%s2548_s23 + $0x40] sm:$0xf] }
  0x49   : > { %v617_v56 = vrot.slane %v616_v38, 4  ;;  %2404 = vmatprep.subr.bf16.mxu0 %v2481_v58  ;;  %2441 = vmatprep.subr.bf16.mxu1 %v2481_v58  ;;  %v434_v62 = vor.u32 %v433_v55, %v429_v35  ;;  %v437_v63 = vshll.u32 %v273_v60, 16  ;;  %v844_v49 = vrot.slane %v842_v52, 4 }
  0x4a   : > { %v627_v59 = vrot.slane %v626_v40, 4  ;;  %v647_v33 = vshrl.u32 %v2929_v25, 16  ;;  %v643_v3 = vshll.u32 %v2929_v25, 16  ;;  %v789_v36 = vrot.slane %v273_v60, 5  ;;  %v2958_v40 = vld [vmem:[%s2548_s23 + $0x3c] sm:$0xf] }
  0x4b   : > { %1252 = vrot.lane.b32.xlu0 %v2720_v37, %s2500_s29  ;;  %2405 = vmatpush3.bf16.msra.mxu0 %v2481_v58  ;;  %v622_v7 = vsel %vm2625_vm5, %v617_v56, %v621_v6  ;;  %v439_v23 = vrot.slane %v437_v63, 5  ;;  %v634_v6 = vshrl.u32 %v2926_v20, 16  ;;  %v846_v29 = vsel %vm2580_vm4, %v844_v49, %v845_v26 }
  0x4c   : > { %1303 = vrot.lane.b32.xlu1 %v2729_v48, %s2501_s30  ;;  %v632_v8 = vsel %vm2625_vm5, %v627_v59, %v631_v15  ;;  %2444 = vmatpush3.bf16.msra.mxu1 %v2481_v58  ;;  %v445_v55 = vshll.u32 %v2958_v40, 16  ;;  %v455_v56 = vshrl.u32 %v2961_v42, 16  ;;  %v451_v59 = vshll.u32 %v2961_v42, 16 }
  0x4d   : > { %v636_v58 = vrot.slane %v634_v6, 4 }
  0x4f   : > { %1254 = vrot.lane.b32.xlu0 %v2806_v46, %s2500_s29 }
  0x50   : > { %1305 = vrot.lane.b32.xlu1 %v2810_v47, %s2501_s30 }
  0x53   : > { %1287 = vrot.lane.b32.xlu0 %v2756_v2, %s2501_s30 }
  0x54   : > { %1338 = vrot.lane.b32.xlu1 %v2761_v50, %s2502_s6 }
  0x57   : > { %1289 = vrot.lane.b32.xlu0 %v2824_v53, %s2501_s30 }
  0x58   : > { %1052 = vrot.lane.b32.xlu1 %v2729_v48, %s2497_s26  ;;  %v783_v48 = vsel %vm2580_vm4, %v781_v19, %v782_v5  ;;  %v2266_v19 = vrot.slane %v2849_v21, 9  ;;  %v2922_v5 = vcombine.low %v622_v7, %v632_v8  ;;  %v786_v21 = vrot.slane %v2872_v27, 5 }
  0x59   : > { %v2856_v13 = vcombine.low %v780_v17, %v783_v48  ;;  %v435_v48 = vrot.slane %v434_v62, 4  ;;  %v2982_v62 = vcombine.low %v2926_v20, %v2929_v25  ;;  %v447_v7 = vrot.slane %v445_v55, 5 }
  0x5a   : > { %v843_v0 = vsel %vm2580_vm4, %v2266_v19, %v842_v52  ;;  %v788_v31 = vrot.slane %v786_v21, 4  ;;  %v453_v8 = vrot.slane %v451_v59, 5  ;;  %v457_v52 = vrot.slane %v455_v56, 4 }
  0x5b   : > { %1322 = vrot.lane.b32.xlu0 %v2785_v30, %s2502_s6  ;;  %v440_v28 = vsel %vm2625_vm5, %v435_v48, %v439_v23  ;;  %v2955_v38 = vcombine.low %v843_v0, %v846_v29  ;;  %3933 = vst [vmem:[#allocation7_spill] sm:$0xff] %v2982_v62  ;;  %v276_v23 = vld [vmem:[%s2548_s23 + $0x44] sm:$0x1]  ;;  %v3001_v0 = vcombine.low %v2958_v40, %v2961_v42 }
  0x5c   : > { %1340 = vrot.lane.b32.xlu1 %v2837_v11, %s2502_s6  ;;  %v458_v26 = vor.u32 %v457_v52, %v453_v8 }
  0x5d   : > { %3934 = vst [vmem:[#allocation8_spill] sm:$0xff] %v3001_v0 }
  0x5f   : > { %1036 = vrot.lane.b32.xlu0 %v2756_v2, %s2497_s26  ;;  %v2869_v2 = vld [vmem:[%s2548_s23 + $0x30] sm:$0xf] }
  0x60   : > { %1054 = vrot.lane.b32.xlu1 %v2810_v47, %s2497_s26  ;;  %v421_v34 = vshll.u32 %v2869_v2, 16  ;;  %v2917_v18 = vcombine.low %v2869_v2, %v2872_v27  ;;  %v637_v27 = vshll.u32 %v2926_v20, 16 }
  0x62   : > { %v423_v45 = vrot.slane %v421_v34, 5  ;;  %3932 = vst [vmem:[#allocation6_spill] sm:$0xff] %v2917_v18  ;;  %v2258_v34 = vrot.slane %v2869_v2, 9  ;;  %v639_v44 = vrot.slane %v637_v27, 5  ;;  %v459_v27 = vrot.slane %v458_v26, 4 }
  0x63   : > { %1324 = vrot.lane.b32.xlu0 %v2856_v13, %s2502_s6 }
  0x64   : > { %1132 = vrot.lane.b32.xlu1 %v2761_v50, %s2496_s25  ;;  %v418_v50 = vshrl.u32 %v2869_v2, 16  ;;  %v787_v2 = vsel %vm2580_vm4, %v2258_v34, %v786_v21  ;;  %v640_v15 = vor.u32 %v639_v44, %v636_v58  ;;  %v461_v21 = vshll.u32 %v276_v23, 16 }
  0x65   : > { %v849_v34 = vrot.slane %v2929_v25, 5  ;;  %v2267_v44 = vrot.slane %v2926_v20, 9 }
  0x66   : > { %v420_v39 = vrot.slane %v418_v50, 4  ;;  %v641_v19 = vrot.slane %v640_v15, 4  ;;  %v796_v15 = vrot.slane %v276_v23, 5 }
  0x67   : > { %1038 = vrot.lane.b32.xlu0 %v2824_v53, %s2497_s26  ;;  %v850_v20 = vsel %vm2580_vm4, %v2267_v44, %v849_v34 }
  0x68   : > { %1134 = vrot.lane.b32.xlu1 %v2837_v11, %s2496_s25  ;;  %v424_v61 = vor.u32 %v423_v45, %v420_v39  ;;  %v645_v39 = vrot.slane %v643_v3, 5  ;;  %v649_v45 = vrot.slane %v647_v33, 4  ;;  %v463_v33 = vrot.slane %v461_v21, 5  ;;  %v3087_v21 = vld [vmem:[%s2548_s23 + $0x4c] sm:$0xf] }
  0x69   : > { %v475_v44 = vshll.u32 %v3087_v21, 16 }
  0x6a   : > { %v425_v17 = vrot.slane %v424_v61, 4  ;;  %v650_v60 = vor.u32 %v649_v45, %v645_v39  ;;  %v464_v58 = vsel %vm2625_vm5, %v459_v27, %v463_v33 }
  0x6b   : > { %1116 = vrot.lane.b32.xlu0 %v2785_v30, %s2496_s25  ;;  %v2484_v30 = vld [vmem:[%s3912_s1] sm:$0xff]  }
  0x6c   : > { %1167 = vrot.lane.b32.xlu1 %v2789_v32, %s2495_s24  ;;  %2406 = vmatprep.subr.bf16.mxu0 %v2484_v30 }
  0x6d   : > { %2442 = vmatprep.subr.bf16.mxu1 %v2484_v30  ;;  %2407 = vmatpush3.bf16.msra.mxu0 %v2484_v30 }
  0x6e   : > { %2445 = vmatpush3.bf16.msra.mxu1 %v2484_v30 }
  0x6f   : > { %1118 = vrot.lane.b32.xlu0 %v2856_v13, %s2496_s25 }
  0x70   : > { %1169 = vrot.lane.b32.xlu1 %v2896_v43, %s2495_s24 }
  0x73   : > { %1151 = vrot.lane.b32.xlu0 %v2806_v46, %s2495_s24 }
  0x74   : > { %1202 = vrot.lane.b32.xlu1 %v2810_v47, %s2498_s27  ;;  %v430_v47 = vsel %vm2625_vm5, %v425_v17, %v429_v35  ;;  %v442_v35 = vshrl.u32 %v2958_v40, 16  ;;  %v651_v17 = vrot.slane %v650_v60, 4 }
  0x75   : > { %v2950_v50 = vcombine.low %v430_v47, %v440_v28  ;;  %v646_v47 = vsel %vm2625_vm5, %v641_v19, %v645_v39  ;;  %v851_v39 = vrot.slane %v849_v34, 4  ;;  %v303_v34 = vld [vmem:[%s2548_s23 + $0xb0] sm:$0x1] }
  0x76   : > { %v444_v63 = vrot.slane %v442_v35, 4  ;;  %v793_v35 = vrot.slane %v2961_v42, 5  ;;  %v2259_v42 = vrot.slane %v2958_v40, 9  ;;  %v3058_v40 = vld [vmem:[%s2548_s23 + $0xa8] sm:$0xf] }
  0x77   : > { %1153 = vrot.lane.b32.xlu0 %v2917_v18, %s2495_s24  ;;  %v658_v19 = vshrl.u32 %v3058_v40, 16 }
  0x78   : > { %1204 = vrot.lane.b32.xlu1 %v2922_v5, %s2498_s27  ;;  %v448_v49 = vor.u32 %v447_v7, %v444_v63  ;;  %v795_v59 = vrot.slane %v793_v35, 4  ;;  %v3061_v7 = vld [vmem:[%s2548_s23 + $0xac] sm:$0xf] }
  0x79   : > { %v667_v23 = vshll.u32 %v3061_v7, 16 }
  0x7a   : > { %v449_v29 = vrot.slane %v448_v49, 4 }
  0x7b   : > { %1186 = vrot.lane.b32.xlu0 %v2824_v53, %s2498_s27  ;;  %v300_v53 = vld [vmem:[%s2548_s23 + $0xa4] sm:$0x1] }
  0x7c   : > { %1237 = vrot.lane.b32.xlu1 %v2837_v11, %s2499_s28  ;;  %v790_v11 = vsel %vm2580_vm4, %v788_v31, %v789_v36  ;;  %v653_v30 = vshll.u32 %v300_v53, 16  ;;  %v454_v36 = vsel %vm2625_vm5, %v449_v29, %v453_v8  ;;  %v852_v45 = vrot.slane %v300_v53, 5 }
  0x7d   : > { %v2978_v61 = vcombine.low %v787_v2, %v790_v11  ;;  %v3025_v25 = vcombine.low %v454_v36, %v464_v58  ;;  %v669_v29 = vrot.slane %v667_v23, 5  ;;  %v479_v58 = vshrl.u32 %v3087_v21, 16 }
  0x7e   : > { %v655_v48 = vrot.slane %v653_v30, 5  ;;  %v853_v53 = vsel %vm2580_vm4, %v851_v39, %v852_v45  ;;  %v794_v30 = vsel %vm2580_vm4, %v2259_v42, %v793_v35  ;;  %v3108_v42 = vcombine.low %v3058_v40, %v3061_v7 }
  0x7f   : > { %1188 = vrot.lane.b32.xlu0 %v2950_v50, %s2498_s27  ;;  %v3042_v56 = vcombine.low %v850_v20, %v853_v53  ;;  %v677_v20 = vshll.u32 %v303_v34, 16 }
  0x80   : > { %1239 = vrot.lane.b32.xlu1 %v2955_v38, %s2499_s28  ;;  %v656_v28 = vsel %vm2625_vm5, %v651_v17, %v655_v48  ;;  %v661_v17 = vshll.u32 %v3058_v40, 16  ;;  %v671_v48 = vshrl.u32 %v3061_v7, 16 }
  0x81   : > { %v3005_v6 = vcombine.low %v646_v47, %v656_v28  ;;  %v660_v47 = vrot.slane %v658_v19, 4  ;;  %v481_v19 = vrot.slane %v479_v58, 4 }
  0x82   : > { %v663_v28 = vrot.slane %v661_v17, 5  ;;  %v673_v27 = vrot.slane %v671_v48, 4 }
  0x83   : > { %1221 = vrot.lane.b32.xlu0 %v2856_v13, %s2499_s28 }
  0x84   : > { %1272 = vrot.lane.b32.xlu1 %v2896_v43, %s2500_s29  ;;  %v664_v45 = vor.u32 %v663_v28, %v660_v47  ;;  %v674_v35 = vor.u32 %v673_v27, %v669_v29  ;;  %v679_v47 = vrot.slane %v677_v20, 5 }
  0x86   : > { %v2991_v13 = vpop.permute.xlu1 %1163  ;;  %v665_v48 = vrot.slane %v664_v45, 4  ;;  %v675_v23 = vrot.slane %v674_v35, 4 }
  0x87   : > { %1223 = vrot.lane.b32.xlu0 %v2978_v61, %s2499_s28 }
  0x88   : > { %1274 = vrot.lane.b32.xlu1 %v2982_v62, %s2500_s29  ;;  %v3007_v3 = vpop.permute.xlu0 %1147  ;;  %v680_v45 = vsel %vm2625_vm5, %v675_v23, %v679_v47 }
  0x8b   : > { %1256 = vrot.lane.b32.xlu0 %v2917_v18, %s2500_s29  ;;  %v3152_v18 = vld [vmem:[%s2548_s23 + $0xb8] sm:$0xf] }
  0x8c   : > { %1307 = vrot.lane.b32.xlu1 %v2922_v5, %s2501_s30 }
  0x8e   : > { %v3010_v31 = vpop.permute.xlu1 %1128 }
  0x8f   : > { %1258 = vrot.lane.b32.xlu0 %v3001_v0, %s2500_s29 }
  0x90   : > { %1309 = vrot.lane.b32.xlu1 %v3005_v6, %s2501_s30  ;;  %v3027_v11 = vpop.permute.xlu0 %1112 }
  0x92   : > { %v3021_v2 = vpop.permute.xlu1 %1130 }
  0x93   : > { %1291 = vrot.lane.b32.xlu0 %v2950_v50, %s2501_s30 }
  0x94   : > { %1342 = vrot.lane.b32.xlu1 %v2955_v38, %s2502_s6  ;;  %v3045_v60 = vpop.permute.xlu0 %1114 }
  0x97   : > { %1293 = vrot.lane.b32.xlu0 %v3025_v25, %s2501_s30  ;;  %v3040_v55 = vpop.permute.xlu1 %1034 }
  0x98   : > { %1056 = vrot.lane.b32.xlu1 %v2922_v5, %s2497_s26  ;;  %v797_v5 = vsel %vm2580_vm4, %v795_v59, %v796_v15  ;;  %v3113_v59 = vld [vmem:[%s2548_s23 + $0x50] sm:$0x1] }
  0x99   : > { %v3067_v52 = vcombine.low %v794_v30, %v797_v5  ;;  %v477_v5 = vrot.slane %v475_v44, 5  ;;  %v670_v44 = vsel %vm2625_vm5, %v665_v48, %v669_v29 }
  0x9a   : > { %v3142_v29 = vcombine.low %v670_v44, %v680_v45  ;;  %v695_v44 = vshrl.u32 %v3152_v18, 16 }
  0x9b   : > { %1326 = vrot.lane.b32.xlu0 %v2978_v61, %s2502_s6 }
  0x9c   : > { %1344 = vrot.lane.b32.xlu1 %v3042_v56, %s2502_s6  ;;  %v3065_v8 = vpop.permute.xlu0 %1032 }
  0x9e   : > { %v3055_v63 = vpop.permute.xlu1 %1050 }
  0x9f   : > { %1040 = vrot.lane.b32.xlu0 %v2950_v50, %s2497_s26  ;;  %v3082_v50 = vld [vmem:[%s2548_s23 + $0x48] sm:$0xf] }
  0xa0   : > { %1058 = vrot.lane.b32.xlu1 %v3005_v6, %s2497_s26  ;;  %v469_v36 = vshll.u32 %v3082_v50, 16  ;;  %v3137_v20 = vcombine.low %v3082_v50, %v3087_v21 }
  0xa2   : > { %v3075_v49 = vpop.permute.xlu1 %1165  ;;  %v471_v30 = vrot.slane %v469_v36, 5  ;;  %v856_v36 = vrot.slane %v3061_v7, 5 }
  0xa3   : > { %1328 = vrot.lane.b32.xlu0 %v3067_v52, %s2502_s6 }
  0xa4   : > { %1136 = vrot.lane.b32.xlu1 %v2955_v38, %s2496_s25  ;;  %v466_v38 = vshrl.u32 %v3082_v50, 16  ;;  %v858_v23 = vrot.slane %v856_v36, 4 }
  0xa5   : > { %v3084_v26 = vpop.permute.xlu0 %1048 }
  0xa6   : > { %v3089_v33 = vpop.permute.xlu1 %1198  ;;  %v468_v15 = vrot.slane %v466_v38, 4  ;;  %v482_v38 = vor.u32 %v481_v19, %v477_v5 }
  0xa7   : > { %1042 = vrot.lane.b32.xlu0 %v3025_v25, %s2497_s26 }
  0xa8   : > { %1138 = vrot.lane.b32.xlu1 %v3042_v56, %s2496_s25  ;;  %v472_v27 = vor.u32 %v471_v30, %v468_v15  ;;  %v2268_v15 = vrot.slane %v3058_v40, 9  ;;  %v859_v30 = vrot.slane %v303_v34, 5  ;;  %v483_v48 = vrot.slane %v482_v38, 4 }
  0xa9   : > { %v3100_v39 = vpop.permute.xlu0 %1149  ;;  %v3156_v40 = vcombine.low %v2568_v12, %v2573_v14 }
  0xaa   : > { %v3102_v53 = vpop.permute.xlu1 %1200  ;;  %v473_v19 = vrot.slane %v472_v27, 4  ;;  %v857_v27 = vsel %vm2580_vm4, %v2268_v15, %v856_v36  ;;  %v860_v12 = vsel %vm2580_vm4, %v858_v23, %v859_v30  ;;  %v803_v30 = vrot.slane %v3113_v59, 5  ;;  %v3195_v23 = vld [vmem:[%s2548_s23 + $0x54] sm:$0xf] }
  0xab   : > { %1120 = vrot.lane.b32.xlu0 %v2978_v61, %s2496_s25  ;;  %v485_v61 = vshll.u32 %v3113_v59, 16 }
  0xac   : > { %1171 = vrot.lane.b32.xlu1 %v2982_v62, %s2495_s24  ;;  %v478_v34 = vsel %vm2625_vm5, %v473_v19, %v477_v5  ;;  %v691_v5 = vshll.u32 %v3152_v18, 16  ;;  %v2272_v19 = vcombine.low %v2590_v22, %v2593_v24  ;;  %v697_v22 = vrot.slane %v695_v44, 4 }
  0xad   : > { %v3115_v17 = vpop.permute.xlu0 %1182  ;;  %v487_v7 = vrot.slane %v485_v61, 5 }
  0xae   : > { %v3117_v28 = vpop.permute.xlu1 %1233  ;;  %v3202_v43 = vrot.slane %v691_v5, 5  ;;  %v1357_v46 = vsel %vm1354_vm7, %v2272_v19, %v3065_v8 }
  0xaf   : > { %1122 = vrot.lane.b32.xlu0 %v3067_v52, %s2496_s25  ;;  %v488_v61 = vsel %vm2625_vm5, %v483_v48, %v487_v7  ;;  %v2260_v7 = vrot.slane %v3082_v50, 9  ;;  %v1381_v48 = vsel %vm1354_vm7, %v3156_v40, %v3084_v26  ;;  %v3192_v50 = vcombine.low %v857_v27, %v860_v12  ;;  %v3207_v26 = vld [vmem:[%s2548_s23 + $0xbc] sm:$0x1] }
  0xb0   : > { %1173 = vrot.lane.b32.xlu1 %v3108_v42, %s2495_s24  ;;  %v3182_v36 = vcombine.low %v478_v34, %v488_v61  ;;  %v3200_v34 = vld [vmem:[%s2548_s23 + $0x58] sm:$0xf]  ;;  %v1421_v27 = vsel %vm1403_vm8, %v1381_v48, %v3010_v31 }
  0xb1   : > { %v3125_v58 = vpop.permute.xlu0 %1184  ;;  %v499_v44 = vshll.u32 %v3200_v34, 16 }
  0xb2   : > { %v3131_v35 = vpop.permute.xlu1 %1235 }
  0xb3   : > { %1155 = vrot.lane.b32.xlu0 %v3001_v0, %s2495_s24  ;;  %v3149_v0 = vld [vmem:[%s2548_s23 + $0xb4] sm:$0xf] }
  0xb4   : > { %1206 = vrot.lane.b32.xlu1 %v3005_v6, %s2498_s27  ;;  %v800_v6 = vrot.slane %v3087_v21, 5  ;;  %v682_v21 = vshrl.u32 %v3149_v0, 16  ;;  %v685_v38 = vshll.u32 %v3149_v0, 16  ;;  %v3231_v57 = vcombine.low %v3149_v0, %v3152_v18 }
  0xb5   : > { %v3144_v47 = vpop.permute.xlu0 %1217 }
  0xb6   : > { %v3146_v62 = vpop.permute.xlu1 %1268  ;;  %v802_v15 = vrot.slane %v800_v6, 4  ;;  %v684_v59 = vrot.slane %v682_v21, 4  ;;  %v687_v61 = vrot.slane %v685_v38, 5  ;;  %v490_v21 = vshrl.u32 %v3195_v23, 16 }
  0xb7   : > { %1157 = vrot.lane.b32.xlu0 %v3137_v20, %s2495_s24  ;;  %v493_v38 = vshll.u32 %v3195_v23, 16 }
  0xb8   : > { %1208 = vrot.lane.b32.xlu1 %v3142_v29, %s2498_s27  ;;  %v804_v12 = vsel %vm2580_vm4, %v802_v15, %v803_v30  ;;  %v688_v5 = vor.u32 %v687_v61, %v684_v59  ;;  %v701_v15 = vshll.u32 %v3207_v26, 16  ;;  %v1454_v30 = vsel %vm1436_vm9, %v1421_v27, %v2991_v13 }
  0xb9   : > { %v3171_v14 = vpop.permute.xlu0 %1219  ;;  %v1487_v59 = vsel %vm1469_vm10, %v1454_v30, %v3089_v33  ;;  %v492_v61 = vrot.slane %v490_v21, 4  ;;  %v3246_v27 = vrot.slane %v499_v44, 5 }
  0xba   : > { %v3177_v45 = vpop.permute.xlu1 %1270  ;;  %v1520_v13 = vsel %vm1502_vm11, %v1487_v59, %v3117_v28  ;;  %v703_v21 = vrot.slane %v701_v15, 5  ;;  %v1384_v28 = vsel %vm1354_vm7, %v2560_v4, %v3055_v63 }
  0xbb   : > { %1190 = vrot.lane.b32.xlu0 %v3025_v25, %s2498_s27  ;;  %v1553_v33 = vsel %vm1535_vm12, %v1520_v13, %v3146_v62 }
  0xbc   : > { %1241 = vrot.lane.b32.xlu1 %v3042_v56, %s2499_s28  ;;  %v801_v56 = vsel %vm2580_vm4, %v2260_v7, %v800_v6  ;;  %v503_v6 = vshrl.u32 %v3200_v34, 16  ;;  %v698_v7 = vor.u32 %v697_v22, %v3202_v43  ;;  %v495_v22 = vrot.slane %v493_v38, 5 }
  0xbd   : > { %v3197_v25 = vpop.permute.xlu0 %1252  ;;  %v3227_v48 = vcombine.low %v801_v56, %v804_v12  ;;  %v3244_v56 = vld [vmem:[%s2548_s23 + $0x5c] sm:$0x1]  ;;  %v689_v12 = vrot.slane %v688_v5, 4  ;;  %v1405_v38 = vsel %vm1403_vm8, %v1357_v46, %v3027_v11  ;;  %v1423_v11 = vsel %vm1403_vm8, %v1384_v28, %v3021_v2 }
  0xbe   : > { %v1304_v24 = vpop.permute.xlu1 %1303  ;;  %v505_v8 = vrot.slane %v503_v6, 4  ;;  %v496_v62 = vor.u32 %v495_v22, %v492_v61  ;;  %v509_v44 = vshll.u32 %v3244_v56, 16  ;;  %v1438_v63 = vsel %vm1436_vm9, %v1405_v38, %v3007_v3 }
  0xbf   : > { %1192 = vrot.lane.b32.xlu0 %v3182_v36, %s2498_s27  ;;  %v1586_v30 = vsel %vm1568_vm13, %v1553_v33, %v1304_v24  ;;  %v694_v5 = vsel %vm2625_vm5, %v689_v12, %v3202_v43  ;;  %v1456_v15 = vsel %vm1436_vm9, %v1423_v11, %v3075_v49  ;;  %v1471_v61 = vsel %vm1469_vm10, %v1438_v63, %v3115_v17 }
  0xc0   : > { %1243 = vrot.lane.b32.xlu1 %v3192_v50, %s2499_s28  ;;  %v506_v46 = vor.u32 %v505_v8, %v3246_v27  ;;  %v3279_v2 = vcombine.low %v3195_v23, %v3200_v34  ;;  %v1489_v3 = vsel %vm1469_vm10, %v1456_v15, %v3102_v53  ;;  %v1504_v43 = vsel %vm1502_vm11, %v1471_v61, %v3144_v47 }
  0xc1   : > { %v3221_v31 = vpop.permute.xlu0 %1254  ;;  %v497_v13 = vrot.slane %v496_v62, 4  ;;  %v511_v49 = vrot.slane %v509_v44, 5  ;;  %v1522_v17 = vsel %vm1502_vm11, %v1489_v3, %v3131_v35  ;;  %v1537_v8 = vsel %vm1535_vm12, %v1504_v43, %v3197_v25  ;;  %v308_v43 = vld [vmem:[%s2548_s23 + $0xc4] sm:$0xf] }
  0xc2   : > { %v1306_v54 = vpop.permute.xlu1 %1305  ;;  %v507_v53 = vrot.slane %v506_v46, 4  ;;  %v1360_v47 = vsel %vm1354_vm7, %v2565_v10, %v3040_v55  ;;  %v1555_v12 = vsel %vm1535_vm12, %v1522_v17, %v3177_v45  ;;  %v863_v35 = vrot.slane %v3152_v18, 5 }
  0xc3   : > { %1225 = vrot.lane.b32.xlu0 %v3067_v52, %s2499_s28  ;;  %v699_v52 = vrot.slane %v698_v7, 4  ;;  %v1588_v25 = vsel %vm1568_vm13, %v1555_v12, %v1306_v54  ;;  %v1407_v55 = vsel %vm1403_vm8, %v1360_v47, %v3045_v60  ;;  %v502_v54 = vsel %vm2625_vm5, %v497_v13, %v3246_v27 }
  0xc4   : > { %1276 = vrot.lane.b32.xlu1 %v3108_v42, %s2500_s29  ;;  %v512_v18 = vsel %vm2625_vm5, %v507_v53, %v511_v49  ;;  %v1440_v45 = vsel %vm1436_vm9, %v1407_v55, %v3100_v39  ;;  %v865_v60 = vrot.slane %v863_v35, 4  ;;  %v882_v53 = vshrl.u32 %v308_v43, 16 }
  0xc5   : > { %v1288_v19 = vpop.permute.xlu0 %1287  ;;  %v704_v7 = vsel %vm2625_vm5, %v699_v52, %v703_v21  ;;  %v3334_v44 = vcombine.low %v502_v54, %v512_v18  ;;  %v878_v47 = vshll.u32 %v308_v43, 16 }
  0xc6   : > { %v1339_v59 = vpop.permute.xlu1 %1338  ;;  %v3295_v33 = vcombine.low %v694_v5, %v704_v7  ;;  %v1570_v52 = vsel %vm1568_vm13, %v1537_v8, %v1288_v19  ;;  %v810_v5 = vrot.slane %v3244_v56, 5  ;;  %v307_v56 = vld [vmem:[%s2548_s23 + $0xc0] sm:$0xf] }
  0xc7   : > { %1227 = vrot.lane.b32.xlu0 %v3227_v48, %s2499_s28  ;;  %v1619_v6 = vsel %vm1601_vm14, %v1586_v30, %v1339_v59  ;;  %v2269_v30 = vrot.slane %v3149_v0, 9  ;;  %v866_v59 = vrot.slane %v3207_v26, 5  ;;  %v807_v0 = vrot.slane %v3200_v34, 5 }
  0xc8   : > { %1278 = vrot.lane.b32.xlu1 %v3231_v57, %s2500_s29  ;;  %2424 = vmatprep.mubr.msk.bf16.mxu1 %vm1656_vm15, %v1619_v6  ;;  %v1473_v6 = vsel %vm1469_vm10, %v1440_v45, %v3125_v58  ;;  %v869_v17 = vshrl.u32 %v307_v56, 16  ;;  %v872_v8 = vshll.u32 %v307_v56, 16  ;;  %v2320_v45 = vcombine.low %v307_v56, %v308_v43 }
  0xc9   : > { %v1290_v24 = vpop.permute.xlu0 %1289  ;;  %v1506_v27 = vsel %vm1502_vm11, %v1473_v6, %v3171_v14  ;;  %v864_v46 = vsel %vm2580_vm4, %v2269_v30, %v863_v35  ;;  %v867_v14 = vsel %vm2580_vm4, %v865_v60, %v866_v59  ;;  %v880_v35 = vrot.slane %v878_v47, 5 }
  0xca   : > { %v3281_v22 = vpop.permute.xlu1 %1052  ;;  %v1539_v39 = vsel %vm1535_vm12, %v1506_v27, %v3221_v31  ;;  %v3354_v34 = vcombine.low %v864_v46, %v867_v14  ;;  %v2261_v31 = vrot.slane %v3195_v23, 9 }
  0xcb   : > { %1260 = vrot.lane.b32.xlu0 %v3137_v20, %s2500_s29  ;;  %v1572_v58 = vsel %vm1568_vm13, %v1539_v39, %v1290_v24  ;;  %v809_v24 = vrot.slane %v807_v0, 4 }
  0xcc   : > { %1311 = vrot.lane.b32.xlu1 %v3142_v29, %s2501_s30 }
  0xcd   : > { %v1323_v21 = vpop.permute.xlu0 %1322  ;;  %v811_v61 = vsel %vm2580_vm4, %v809_v24, %v810_v5  ;;  %v3429_v5 = vld [vmem:[%s2548_s23 + $0xcc] sm:$0xf] }
  0xce   : > { %v1603_v38 = vsel %vm1601_vm14, %v1570_v52, %v1323_v21  ;;  %v1341_v28 = vpop.permute.xlu1 %1340  ;;  %v871_v52 = vrot.slane %v869_v17, 4  ;;  %v874_v21 = vrot.slane %v872_v8, 5 }
  0xcf   : > { %1262 = vrot.lane.b32.xlu0 %v3279_v2, %s2500_s29  ;;  %2408 = vmatprep.mubr.msk.bf16.mxu0 %vm1656_vm15, %v1603_v38  ;;  %v1621_v10 = vsel %vm1601_vm14, %v1588_v25, %v1341_v28  ;;  %v884_v25 = vrot.slane %v882_v53, 4  ;;  %v309_v28 = vld [vmem:[%s2548_s23 + $0xc8] sm:$0x1] }
  0xd0   : > { %1313 = vrot.lane.b32.xlu1 %v3295_v33, %s2501_s30  ;;  %2425 = vmatmul.mubr.msk.bf16.vlgmr.msra.gmra.mxu1 %vm1656_vm15, %v1621_v10  ;;  %v875_v55 = vor.u32 %v874_v21, %v871_v52  ;;  %v900_v24 = vrot.slane %v309_v28, 5 }
  0xd1   : > { %v3322_v19 = vpop.permute.xlu0 %1036  ;;  %v885_v54 = vor.u32 %v884_v25, %v880_v35 }
  0xd2   : > { %v3328_v62 = vpop.permute.xlu1 %1054  ;;  %v876_v60 = vrot.slane %v875_v55, 4 }
  0xd3   : > { %1295 = vrot.lane.b32.xlu0 %v3182_v36, %s2501_s30  ;;  %v886_v59 = vrot.slane %v885_v54, 4 }
  0xd4   : > { %1346 = vrot.lane.b32.xlu1 %v3192_v50, %s2502_s6 }
  0xd5   : > { %v1325_v26 = vpop.permute.xlu0 %1324 }
  0xd6   : > { %v1605_v11 = vsel %vm1601_vm14, %v1572_v58, %v1325_v26  ;;  %v3347_v63 = vpop.permute.xlu1 %1132  ;;  %v897_v58 = vrot.slane %v308_v43, 5  ;;  %v906_v43 = vshll.u32 %v3429_v5, 16 }
  0xd7   : > { %1297 = vrot.lane.b32.xlu0 %v3334_v44, %s2501_s30  ;;  %2409 = vmatmul.mubr.msk.bf16.vlgmr.msra.gmra.mxu0 %vm1656_vm15, %v1605_v11  ;;  %v2270_v11 = vrot.slane %v307_v56, 9 }
  0xd8   : > { %1060 = vrot.lane.b32.xlu1 %v3142_v29, %s2497_s26  ;;  %v808_v29 = vsel %vm2580_vm4, %v2261_v31, %v807_v0  ;;  %v899_v31 = vrot.slane %v897_v58, 4  ;;  %v908_v25 = vrot.slane %v906_v43, 5 }
  0xd9   : > { %v3358_v7 = vpop.permute.xlu0 %1038  ;;  %v3378_v13 = vcombine.low %v808_v29, %v811_v61  ;;  %v3432_v61 = vld [vmem:[%s2548_s23 + $0xd0] sm:$0xf]  ;;  %v898_v56 = vsel %vm2580_vm4, %v2270_v11, %v897_v58 }
  0xda   : > { %v3360_v15 = vpop.permute.xlu1 %1134  ;;  %v901_v8 = vsel %vm2580_vm4, %v899_v31, %v900_v24  ;;  %v916_v53 = vshrl.u32 %v3432_v61, 16  ;;  %v912_v47 = vshll.u32 %v3432_v61, 16 }
  0xdb   : > { %1330 = vrot.lane.b32.xlu0 %v3227_v48, %s2502_s6  ;;  %v3452_v21 = vcombine.low %v898_v56, %v901_v8 }
  0xdc   : > { %1348 = vrot.lane.b32.xlu1 %v3354_v34, %s2502_s6  ;;  %v914_v55 = vrot.slane %v912_v47, 5  ;;  %v918_v54 = vrot.slane %v916_v53, 4 }
  0xdd   : > { %v3370_v23 = vpop.permute.xlu0 %1116 }
  0xde   : > { %v3372_v3 = vpop.permute.xlu1 %1167 }
  0xdf   : > { %1044 = vrot.lane.b32.xlu0 %v3182_v36, %s2497_s26 }
  0xe0   : > { %1062 = vrot.lane.b32.xlu1 %v3295_v33, %s2497_s26 }
  0xe1   : > { %v3382_v49 = vpop.permute.xlu0 %1118 }
  0xe2   : > { %v3384_v12 = vpop.permute.xlu1 %1169 }
  0xe3   : > { %1332 = vrot.lane.b32.xlu0 %v3378_v13, %s2502_s6 }
  0xe4   : > { %1140 = vrot.lane.b32.xlu1 %v3192_v50, %s2496_s25  ;;  %v888_v50 = vshll.u32 %v309_v28, 16 }
  0xe5   : > { %v3390_v36 = vpop.permute.xlu0 %1151 }
  0xe6   : > { %v3392_v38 = vpop.permute.xlu1 %1202  ;;  %v890_v6 = vrot.slane %v888_v50, 5 }
  0xe7   : > { %1046 = vrot.lane.b32.xlu0 %v3334_v44, %s2497_s26 }
  0xe8   : > { %1142 = vrot.lane.b32.xlu1 %v3354_v34, %s2496_s25  ;;  %v891_v0 = vsel %vm2625_vm5, %v886_v59, %v890_v6 }
  0xe9   : > { %v3399_v10 = vpop.permute.xlu0 %1153 }
  0xea   : > { %v3401_v18 = vpop.permute.xlu1 %1204 }
  0xeb   : > { %1124 = vrot.lane.b32.xlu0 %v3227_v48, %s2496_s25  ;;  %v881_v48 = vsel %vm2625_vm5, %v876_v60, %v880_v35  ;;  %v3455_v60 = vld [vmem:[%s2548_s23 + $0xd4] sm:$0x1] }
  0xec   : > { %1175 = vrot.lane.b32.xlu1 %v3231_v57, %s2495_s24  ;;  %v3424_v46 = vcombine.low %v881_v48, %v891_v0  ;;  %v919_v48 = vor.u32 %v918_v54, %v914_v55  ;;  %v922_v0 = vshll.u32 %v3455_v60, 16  ;;  %v934_v54 = vrot.slane %v3455_v60, 5 }
  0xed   : > { %v3407_v30 = vpop.permute.xlu0 %1186 }
  0xee   : > { %v1238_v27 = vpop.permute.xlu1 %1237  ;;  %v920_v43 = vrot.slane %v919_v48, 4 }
  0xef   : > { %1126 = vrot.lane.b32.xlu0 %v3378_v13, %s2496_s25  ;;  %s3746_s25 = scalar_lea.vmem %s3916_s5, %s3628_s13 }
  0xf0   : > { %1177 = vrot.lane.b32.xlu1 %v2320_v45, %s2495_s24 }
  0xf1   : > { %v3412_v39 = vpop.permute.xlu0 %1188 }
  0xf2   : > { %v3418_v26 = vpop.permute.xlu1 %1239 }
  0xf3   : > { %1159 = vrot.lane.b32.xlu0 %v3279_v2, %s2495_s24 }
  0xf4   : > { %1210 = vrot.lane.b32.xlu1 %v3295_v33, %s2498_s27  ;;  %v903_v33 = vshrl.u32 %v3429_v5, 16 }
  0xf5   : > { %v3426_v14 = vpop.permute.xlu0 %1221 }
  0xf6   : > { %v1273_v29 = vpop.permute.xlu1 %1272  ;;  %v905_v35 = vrot.slane %v903_v33, 4 }
  0xf7   : > { %1161 = vrot.lane.b32.xlu0 %v3156_v40, %s2495_s24 }
  0xf8   : > { %1212 = vrot.lane.b32.xlu1 %v3424_v46, %s2498_s27 }
  0xf9   : > { %v3440_v17 = vpop.permute.xlu0 %1223 }
  0xfa   : > { %v1275_v52 = vpop.permute.xlu1 %1274 }
  0xfb   : > { %1194 = vrot.lane.b32.xlu0 %v3334_v44, %s2498_s27  ;;  %v1387_v44 = vsel %vm1354_vm7, %v2701_v9, %v3281_v22  ;;  %v2323_v22 = vcombine.low %v3429_v5, %v3432_v61 }
  0xfc   : > { %1245 = vrot.lane.b32.xlu1 %v3354_v34, %s2499_s28  ;;  %v909_v34 = vor.u32 %v908_v25, %v905_v35  ;;  %v1425_v59 = vsel %vm1403_vm8, %v1387_v44, %v3347_v63 }
  0xfd   : > { %v1257_v28 = vpop.permute.xlu0 %1256  ;;  %v1458_v58 = vsel %vm1436_vm9, %v1425_v59, %v3372_v3  ;;  %v924_v3 = vrot.slane %v922_v0, 5 }
  0xfe   : > { %v1308_v50 = vpop.permute.xlu1 %1307  ;;  %v1491_v31 = vsel %vm1469_vm10, %v1458_v58, %v3392_v38  ;;  %v910_v63 = vrot.slane %v909_v34, 4 }
  0xff   : > { %1196 = vrot.lane.b32.xlu0 %v2713_v1, %s2498_s27  ;;  %v1524_v9 = vsel %vm1502_vm11, %v1491_v31, %v1238_v27  ;;  %v3937_v31 = vld [vmem:[#allocation2_spill] sm:$0xff] }
 0x100   : > { %1247 = vrot.lane.b32.xlu1 %v3452_v21, %s2499_s28  ;;  %v1557_v24 = vsel %vm1535_vm12, %v1524_v9, %v1273_v29  ;;  %v915_v29 = vsel %vm2625_vm5, %v910_v63, %v914_v55 }
 0x101   : > { %v3466_v6 = vpop.permute.xlu0 %1258  ;;  %v1590_v56 = vsel %vm1568_vm13, %v1557_v24, %v1308_v50 }
 0x102   : > { %v1310_v11 = vpop.permute.xlu1 %1309 }
 0x103   : > { %1229 = vrot.lane.b32.xlu0 %v3378_v13, %s2499_s28  ;;  %v1363_v13 = vsel %vm1354_vm7, %v2720_v37, %v3322_v19 }
 0x104   : > { %1280 = vrot.lane.b32.xlu1 %v2320_v45, %s2500_s29  ;;  %v1390_v45 = vsel %vm1354_vm7, %v2789_v32, %v3328_v62  ;;  %v1409_v27 = vsel %vm1403_vm8, %v1363_v13, %v3370_v23  ;;  %v925_v32 = vsel %vm2625_vm5, %v920_v43, %v924_v3  ;;  %v931_v62 = vrot.slane %v3432_v61, 5 }
 0x105   : > { %v1292_v33 = vpop.permute.xlu0 %1291  ;;  %v1427_v37 = vsel %vm1403_vm8, %v1390_v45, %v3360_v15  ;;  %v1442_v19 = vsel %vm1436_vm9, %v1409_v27, %v3390_v36 }
 0x106   : > { %v1343_v8 = vpop.permute.xlu1 %1342  ;;  %v1460_v23 = vsel %vm1436_vm9, %v1427_v37, %v3384_v12  ;;  %v1475_v47 = vsel %vm1469_vm10, %v1442_v19, %v3407_v30  ;;  %v2324_v12 = vcombine.low %v915_v29, %v925_v32  ;;  %v2271_v30 = vrot.slane %v3429_v5, 9  ;;  %v3938_v19 = vld [vmem:[#allocation5_spill] sm:$0xff] }
 0x107   : > { %1231 = vrot.lane.b32.xlu0 %v2611_v41, %s2499_s28  ;;  %v1623_v38 = vsel %vm1601_vm14, %v1590_v56, %v1343_v8  ;;  %v1493_v15 = vsel %vm1469_vm10, %v1460_v23, %v3401_v18  ;;  %v1508_v36 = vsel %vm1502_vm11, %v1475_v47, %v3426_v14  ;;  %v933_v14 = vrot.slane %v931_v62, 4 }
 0x108   : > { %1282 = vrot.lane.b32.xlu1 %v2323_v22, %s2500_s29  ;;  %2428 = vmatprep.mubr.msk.bf16.mxu1 %vm1656_vm15, %v1623_v38  ;;  %v1526_v51 = vsel %vm1502_vm11, %v1493_v15, %v3418_v26  ;;  %v1541_v61 = vsel %vm1535_vm12, %v1508_v36, %v1257_v28  ;;  %v3935_v28 = vld [vmem:[#allocation4_spill] sm:$0xff] }
 0x109   : > { %v1294_v53 = vpop.permute.xlu0 %1293  ;;  %v1559_v25 = vsel %vm1535_vm12, %v1526_v51, %v1275_v52  ;;  %v1574_v18 = vsel %vm1568_vm13, %v1541_v61, %v1292_v33 }
 0x10a   : > { %v3507_v35 = vpop.permute.xlu1 %1056 }
 0x10b   : > { %1264 = vrot.lane.b32.xlu0 %v3156_v40, %s2500_s29  ;;  %v1592_v40 = vsel %vm1568_vm13, %v1559_v25, %v1310_v11  ;;  %v3936_v11 = vld [vmem:[#allocation3_spill] sm:$0xff]  ;;  %v3939_v25 = vld [vmem:[#allocation6_spill] sm:$0xff] }
 0x10c   : > { %1315 = vrot.lane.b32.xlu1 %v3424_v46, %s2501_s30  ;;  %v1366_v46 = vsel %vm1354_vm7, %v3935_v28, %v3358_v7  ;;  %v932_v7 = vsel %vm2580_vm4, %v2271_v30, %v931_v62 }
 0x10d   : > { %v1327_v55 = vpop.permute.xlu0 %1326  ;;  %v1411_v52 = vsel %vm1403_vm8, %v1366_v46, %v3382_v49 }
 0x10e   : > { %v1607_v26 = vsel %vm1601_vm14, %v1574_v18, %v1327_v55  ;;  %v1345_v50 = vpop.permute.xlu1 %1344  ;;  %v1444_v60 = vsel %vm1436_vm9, %v1411_v52, %v3399_v10  ;;  %v3940_v55 = vld [vmem:[#allocation7_spill] sm:$0xff] }
 0x10f   : > { %1266 = vrot.lane.b32.xlu0 %v2560_v4, %s2500_s29  ;;  %2412 = vmatprep.mubr.msk.bf16.mxu0 %vm1656_vm15, %v1607_v26  ;;  %v1625_v5 = vsel %vm1601_vm14, %v1592_v40, %v1345_v50  ;;  %v935_v4 = vsel %vm2580_vm4, %v933_v14, %v934_v54  ;;  %v1477_v34 = vsel %vm1469_vm10, %v1444_v60, %v3412_v39 }
 0x110   : > { %1317 = vrot.lane.b32.xlu1 %v2324_v12, %s2501_s30  ;;  %2429 = vmatmul.mubr.msk.bf16.gmra.mxu1 %vm1656_vm15, %v1625_v5  ;;  %v1510_v49 = vsel %vm1502_vm11, %v1477_v34, %v3440_v17  ;;  %v2325_v48 = vcombine.low %v932_v7, %v935_v4 }
 0x111   : > { %v1041_v44 = vpop.permute.xlu0 %1040  ;;  %v1543_v10 = vsel %vm1535_vm12, %v1510_v49, %v3466_v6 }
 0x112   : > { %v1059_v59 = vpop.permute.xlu1 %1058  ;;  %v1576_v16 = vsel %vm1568_vm13, %v1543_v10, %v1294_v53  ;;  %v1393_v53 = vsel %vm1354_vm7, %v3938_v19, %v3507_v35  ;;  %v1369_v18 = vsel %vm1354_vm7, %v3939_v25, %v1041_v44 }
 0x113   : > { %1299 = vrot.lane.b32.xlu0 %v2713_v1, %s2501_s30  ;;  %v1396_v14 = vsel %vm1354_vm7, %v3940_v55, %v1059_v59 }
 0x114   : > { %1350 = vrot.lane.b32.xlu1 %v3452_v21, %s2502_s6 }
 0x115   : > { %v1329_v0 = vpop.permute.xlu0 %1328 }
 0x116   : > { %v1609_v58 = vsel %vm1601_vm14, %v1576_v16, %v1329_v0  ;;  %v1137_v39 = vpop.permute.xlu1 %1136  ;;  %v3941_v16 = vld [vmem:[#allocation8_spill] sm:$0xff] }
 0x117   : > { %1301 = vrot.lane.b32.xlu0 %v3936_v11, %s2501_s30  ;;  %2413 = vmatmul.mubr.msk.bf16.gmra.mxu0 %vm1656_vm15, %v1609_v58  ;;  %v1429_v32 = vsel %vm1403_vm8, %v1393_v53, %v1137_v39 }
 0x118   : > { %1352 = vrot.lane.b32.xlu1 %v2325_v48, %s2502_s6 }
 0x119   : > { %v1043_v1 = vpop.permute.xlu0 %1042 }
 0x11a   : > { %v1139_v17 = vpop.permute.xlu1 %1138  ;;  %v1372_v0 = vsel %vm1354_vm7, %v3941_v16, %v1043_v1 }
 0x11b   : > { %1334 = vrot.lane.b32.xlu0 %v2611_v41, %s2502_s6  ;;  %v1431_v40 = vsel %vm1403_vm8, %v1396_v14, %v1139_v17 }
 0x11d   : > { %v1121_v21 = vpop.permute.xlu0 %1120 }
 0x11e   : > { %v1172_v6 = vpop.permute.xlu1 %1171  ;;  %v1413_v54 = vsel %vm1403_vm8, %v1369_v18, %v1121_v21 }
 0x11f   : > { %1336 = vrot.lane.b32.xlu0 %v3937_v31, %s2502_s6  ;;  %v1462_v23 = vsel %vm1436_vm9, %v1429_v32, %v1172_v6 }
 0x121   : > { %v1123_v9 = vpop.permute.xlu0 %1122 }
 0x122   : > { %v1174_v22 = vpop.permute.xlu1 %1173  ;;  %v1415_v39 = vsel %vm1403_vm8, %v1372_v0, %v1123_v9 }
 0x123   : > { %v1464_v28 = vsel %vm1436_vm9, %v1431_v40, %v1174_v22 }
 0x125   : > { %v1156_v63 = vpop.permute.xlu0 %1155 }
 0x126   : > { %v1207_v24 = vpop.permute.xlu1 %1206  ;;  %v1446_v26 = vsel %vm1436_vm9, %v1413_v54, %v1156_v63 }
 0x127   : > { %v1495_v15 = vsel %vm1469_vm10, %v1462_v23, %v1207_v24 }
 0x129   : > { %v1158_v33 = vpop.permute.xlu0 %1157 }
 0x12a   : > { %v1209_v43 = vpop.permute.xlu1 %1208  ;;  %v1448_v11 = vsel %vm1436_vm9, %v1415_v39, %v1158_v33 }
 0x12b   : > { %v1497_v52 = vsel %vm1469_vm10, %v1464_v28, %v1209_v43 }
 0x12d   : > { %v1191_v3 = vpop.permute.xlu0 %1190 }
 0x12e   : > { %v1242_v56 = vpop.permute.xlu1 %1241  ;;  %v1479_v46 = vsel %vm1469_vm10, %v1446_v26, %v1191_v3 }
 0x12f   : > { %v1528_v36 = vsel %vm1502_vm11, %v1495_v15, %v1242_v56 }
 0x131   : > { %v1193_v8 = vpop.permute.xlu0 %1192 }
 0x132   : > { %v1244_v13 = vpop.permute.xlu1 %1243  ;;  %v1481_v21 = vsel %vm1469_vm10, %v1448_v11, %v1193_v8 }
 0x133   : > { %v1530_v44 = vsel %vm1502_vm11, %v1497_v52, %v1244_v13 }
 0x135   : > { %v1226_v38 = vpop.permute.xlu0 %1225 }
 0x136   : > { %v1277_v45 = vpop.permute.xlu1 %1276  ;;  %v1512_v60 = vsel %vm1502_vm11, %v1479_v46, %v1226_v38 }
 0x137   : > { %v1561_v51 = vsel %vm1535_vm12, %v1528_v36, %v1277_v45 }
 0x139   : > { %v1228_v27 = vpop.permute.xlu0 %1227 }
 0x13a   : > { %v1279_v29 = vpop.permute.xlu1 %1278  ;;  %v1514_v31 = vsel %vm1502_vm11, %v1481_v21, %v1228_v27 }
 0x13b   : > { %v1563_v4 = vsel %vm1535_vm12, %v1530_v44, %v1279_v29 }
 0x13d   : > { %v1261_v41 = vpop.permute.xlu0 %1260 }
 0x13e   : > { %v1312_v37 = vpop.permute.xlu1 %1311  ;;  %v1545_v7 = vsel %vm1535_vm12, %v1512_v60, %v1261_v41 }
 0x13f   : > { %v1594_v12 = vsel %vm1568_vm13, %v1561_v51, %v1312_v37 }
 0x141   : > { %v1263_v62 = vpop.permute.xlu0 %1262 }
 0x142   : > { %v1314_v47 = vpop.permute.xlu1 %1313  ;;  %v1547_v22 = vsel %vm1535_vm12, %v1514_v31, %v1263_v62 }
 0x143   : > { %v1596_v49 = vsel %vm1568_vm13, %v1563_v4, %v1314_v47 }
 0x145   : > { %v1296_v61 = vpop.permute.xlu0 %1295 }
 0x146   : > { %v1347_v30 = vpop.permute.xlu1 %1346  ;;  %v1578_v34 = vsel %vm1568_vm13, %v1545_v7, %v1296_v61 }
 0x147   : > { %v1627_v35 = vsel %vm1601_vm14, %v1594_v12, %v1347_v30 }
 0x148   : > { %2432 = vmatprep.mubr.msk.bf16.mxu1 %vm1656_vm15, %v1627_v35 }
 0x149   : > { %v1298_v50 = vpop.permute.xlu0 %1297 }
 0x14a   : > { %v1061_v5 = vpop.permute.xlu1 %1060  ;;  %v1580_v1 = vsel %vm1568_vm13, %v1547_v22, %v1298_v50  ;;  %v1872_v22 = vld [vmem:[%s3643_s16 + $0x90] sm:$0xff] }
 0x14b   : > { %v1399_v51 = vsel %vm1354_vm7, %v3108_v42, %v1061_v5 }
 0x14d   : > { %v1331_v59 = vpop.permute.xlu0 %1330 }
 0x14e   : > { %v1611_v10 = vsel %vm1601_vm14, %v1578_v34, %v1331_v59  ;;  %v1349_v48 = vpop.permute.xlu1 %1348 }
 0x14f   : > { %2416 = vmatprep.mubr.msk.bf16.mxu0 %vm1656_vm15, %v1611_v10  ;;  %v1629_v58 = vsel %vm1601_vm14, %v1596_v49, %v1349_v48 }
 0x150   : > { %2433 = vmatmul.mubr.msk.bf16.gmra.mxu1 %vm1656_vm15, %v1629_v58 }
 0x151   : > { %v1045_v17 = vpop.permute.xlu0 %1044 }
 0x152   : > { %v1063_v6 = vpop.permute.xlu1 %1062  ;;  %v1375_v28 = vsel %vm1354_vm7, %v3137_v20, %v1045_v17  ;;  %v3650_v17 = vld [vmem:[%s3913_s2] ss:$0 sm:$0xff] }
 0x153   : > { %v1402_v35 = vsel %vm1354_vm7, %v3231_v57, %v1063_v6 }
 0x155   : > { %v1333_v63 = vpop.permute.xlu0 %1332 }
 0x156   : > { %v1613_v24 = vsel %vm1601_vm14, %v1580_v1, %v1333_v63  ;;  %v1141_v43 = vpop.permute.xlu1 %1140 }
 0x157   : > { %2417 = vmatmul.mubr.msk.bf16.gmra.mxu0 %vm1656_vm15, %v1613_v24  ;;  %v1433_v61 = vsel %vm1403_vm8, %v1399_v51, %v1141_v43  ;;  %v3707_v51 = vld [vmem:[%s3643_s16 + $0x58] sm:$0xff] }
 0x159   : > { %v1047_v9 = vpop.permute.xlu0 %1046 }
 0x15a   : > { %v1143_v3 = vpop.permute.xlu1 %1142  ;;  %v1378_v59 = vsel %vm1354_vm7, %v3279_v2, %v1047_v9 }
 0x15b   : > { %v1435_v14 = vsel %vm1403_vm8, %v1402_v35, %v1143_v3  ;;  %v1870_v3 = vld [vmem:[%s3643_s16 + $0x80] sm:$0xff] }
 0x15c   : > { %v3725_v35 = vld [vmem:[%s3643_s16 + $0x60] sm:$0xff] }
 0x15d   : > { %v1125_v56 = vpop.permute.xlu0 %1124 }
 0x15e   : > { %v1176_v33 = vpop.permute.xlu1 %1175  ;;  %v1417_v5 = vsel %vm1403_vm8, %v1375_v28, %v1125_v56  ;;  %v1873_v56 = vld [vmem:[%s3643_s16 + $0x98] sm:$0xff]  ;;  %v3750_v28 = vld [vmem:[%s3643_s16 + $0x68] sm:$0xff] }
 0x15f   : > { %v1466_v30 = vsel %vm1436_vm9, %v1433_v61, %v1176_v33  ;;  %v3710_v61 = vld [vmem:[%s3643_s16 + $0xd8] sm:$0xff] }
 0x161   : > { %v1127_v13 = vpop.permute.xlu0 %1126 }
 0x162   : > { %v1178_v38 = vpop.permute.xlu1 %1177  ;;  %v1419_v48 = vsel %vm1403_vm8, %v1378_v59, %v1127_v13 }
 0x163   : > { %v1468_v42 = vsel %vm1436_vm9, %v1435_v14, %v1178_v38  ;;  %v3664_v38 = vld [vmem:[%s3643_s16 + $0x18] sm:$0xff]  ;;  %v3734_v14 = vld [vmem:[%s3643_s16 + $0xe0] sm:$0xff] }
 0x165   : > { %v1160_v8 = vpop.permute.xlu0 %1159 }
 0x166   : > { %v1211_v45 = vpop.permute.xlu1 %1210  ;;  %v1450_v60 = vsel %vm1436_vm9, %v1417_v5, %v1160_v8  ;;  %v3667_v8 = vld [vmem:[%s3643_s16 + $0x8] sm:$0xff]  ;;  %v2503_v5 = vmov 0.0  }
 0x167   : > { %v1499_v18 = vsel %vm1469_vm10, %v1466_v30, %v1211_v45  ;;  %v1871_v45 = vld [vmem:[%s3643_s16 + $0x88] sm:$0xff] }
 0x168   : > { %v3716_v30 = vld [vmem:[%s3643_s16 + $0xc8] sm:$0xff] }
 0x169   : > { %v1162_v29 = vpop.permute.xlu0 %1161 }
 0x16a   : > { %v1213_v27 = vpop.permute.xlu1 %1212  ;;  %v1452_v0 = vsel %vm1436_vm9, %v1419_v48, %v1162_v29  ;;  %v3671_v29 = vld [vmem:[%s3643_s16 + $0x30] sm:$0xff] }
 0x16b   : > { %v1501_v46 = vsel %vm1469_vm10, %v1468_v42, %v1213_v27  ;;  %v3674_v27 = vld [vmem:[%s3643_s16 + $0xb0] sm:$0xff] }
 0x16d   : > { %v1195_v41 = vpop.permute.xlu0 %1194 }
 0x16e   : > { %v1246_v37 = vpop.permute.xlu1 %1245  ;;  %v1483_v4 = vsel %vm1469_vm10, %v1450_v60, %v1195_v41  ;;  %v3677_v41 = vld [vmem:[%s3643_s16 + $0x20] sm:$0xff] }
 0x16f   : > { %v1532_v55 = vsel %vm1502_vm11, %v1499_v18, %v1246_v37  ;;  %v3680_v37 = vld [vmem:[%s3643_s16 + $0xa0] sm:$0xff]  ;;  %v3722_v18 = vld [vmem:[%s3643_s16 + $0xf0] sm:$0xff] }
 0x171   : > { %v1197_v19 = vpop.permute.xlu0 %1196 }
 0x172   : > { %v1248_v53 = vpop.permute.xlu1 %1247  ;;  %v1485_v2 = vsel %vm1469_vm10, %v1452_v0, %v1197_v19  ;;  %v3683_v19 = vld [vmem:[%s3643_s16 + $0x38] sm:$0xff] }
 0x173   : > { %v1534_v52 = vsel %vm1502_vm11, %v1501_v46, %v1248_v53  ;;  %v3686_v53 = vld [vmem:[%s3643_s16 + $0xb8] sm:$0xff]  ;;  %v3753_v46 = vld [vmem:[%s3643_s16 + $0xe8] sm:$0xff] }
 0x175   : > { %v1230_v32 = vpop.permute.xlu0 %1229 }
 0x176   : > { %v1281_v62 = vpop.permute.xlu1 %1280  ;;  %v1516_v49 = vsel %vm1502_vm11, %v1483_v4, %v1230_v32  ;;  %v3689_v32 = vld [vmem:[%s3643_s16 + $0x28] sm:$0xff]  ;;  %v1854_v4 = vld [vmem:[%s3643_s16] sm:$0xff] }
 0x177   : > { %v1565_v54 = vsel %vm1535_vm12, %v1532_v55, %v1281_v62  ;;  %v3692_v62 = vld [vmem:[%s3643_s16 + $0xa8] sm:$0xff] }
 0x179   : > { %v1232_v23 = vpop.permute.xlu0 %1231 }
 0x17a   : > { %v1283_v47 = vpop.permute.xlu1 %1282  ;;  %v1518_v21 = vsel %vm1502_vm11, %v1485_v2, %v1232_v23  ;;  %v3695_v23 = vld [vmem:[%s3643_s16 + $0x50] sm:$0xff] }
 0x17b   : > { %v1567_v44 = vsel %vm1535_vm12, %v1534_v52, %v1283_v47  ;;  %v3698_v47 = vld [vmem:[%s3643_s16 + $0xd0] sm:$0xff] }
 0x17d   : > { %v1265_v15 = vpop.permute.xlu0 %1264 }
 0x17e   : > { %v1316_v36 = vpop.permute.xlu1 %1315  ;;  %v1549_v16 = vsel %vm1535_vm12, %v1516_v49, %v1265_v15  ;;  %v3701_v15 = vld [vmem:[%s3643_s16 + $0x40] sm:$0xff] }
 0x17f   : > { %v1598_v26 = vsel %vm1568_vm13, %v1565_v54, %v1316_v36  ;;  %v3704_v36 = vld [vmem:[%s3643_s16 + $0xc0] sm:$0xff]  ;;  %v3737_v54 = vld [vmem:[%s3643_s16 + $0x78] sm:$0xff] }
 0x181   : > { %v1267_v12 = vpop.permute.xlu0 %1266 }
 0x182   : > { %v1318_v25 = vpop.permute.xlu1 %1317  ;;  %v1551_v6 = vsel %vm1535_vm12, %v1518_v21, %v1267_v12  ;;  %v3713_v12 = vld [vmem:[%s3643_s16 + $0x48] sm:$0xff] }
 0x183   : > { %v1600_v34 = vsel %vm1568_vm13, %v1567_v44, %v1318_v25  ;;  %v3719_v25 = vld [vmem:[%s3643_s16 + $0x70] sm:$0xff] }
 0x185   : > { %v1300_v40 = vpop.permute.xlu0 %1299 }
 0x186   : > { %v1351_v50 = vpop.permute.xlu1 %1350  ;;  %v1582_v58 = vsel %vm1568_vm13, %v1549_v16, %v1300_v40  ;;  %v3740_v40 = vld [vmem:[%s3643_s16 + $0xf8] sm:$0xff] }
 0x187   : > { %v1631_v57 = vsel %vm1601_vm14, %v1598_v26, %v1351_v50 }
 0x188   : > { %2436 = vmatprep.mubr.msk.bf16.mxu1 %vm1656_vm15, %v1631_v57  ;;  %v1856_v57 = vld [vmem:[%s3643_s16 + $0x10] sm:$0xff] }
 0x189   : > { %v1302_v7 = vpop.permute.xlu0 %1301 }
 0x18a   : > { %v1353_v20 = vpop.permute.xlu1 %1352  ;;  %v1584_v1 = vsel %vm1568_vm13, %v1551_v6, %v1302_v7 }
 0x18b   : > { %v1633_v10 = vsel %vm1601_vm14, %v1600_v34, %v1353_v20 }
 0x18c   : > { %2437 = vmatmul.mubr.msk.bf16.gmra.mxu1 %vm1656_vm15, %v1633_v10 }
 0x18d   : > { %v1335_v39 = vpop.permute.xlu0 %1334 }
 0x18e   : > { %v1615_v11 = vsel %vm1601_vm14, %v1582_v58, %v1335_v39 }
 0x18f   : > { %2420 = vmatprep.mubr.msk.bf16.mxu0 %vm1656_vm15, %v1615_v11 }
 0x190   : > { %v2426_v31 = vpop.f32.mrf.mxu1 }
 0x191   : > { %v1337_v63 = vpop.permute.xlu0 %1336  ;;  %v1800_v24 = vadd.f32 %v2426_v31, %v3650_v17 }
 0x192   : > { %v1617_v43 = vsel %vm1601_vm14, %v1584_v1, %v1337_v63  ;;  %v1791_v9 = vpop.f32.mrf.mxu1 }
 0x193   : > { %2421 = vmatmul.mubr.msk.bf16.gmra.mxu0 %vm1656_vm15, %v1617_v43  ;;  %v1904_v33 = vadd.f32 %v1872_v22, %v1800_v24  ;;  %v1792_v13 = vadd.f32 %v3650_v17, %v1791_v9 }
 0x194   : > { %v2427_v55 = vpop.f32.mrf.mxu1 }
 0x195   : > { %vm1936_vm0 = vcmp.gt.f32.partialorder %v1904_v33, 0.3  ;;  %v2064_v42 = vmul.f32 0.2, %v1904_v33  ;;  %v1902_v26 = vadd.f32 %v1870_v3, %v1792_v13  ;;  %v1803_v50 = vadd.f32 %v2427_v55, %v3650_v17 }
 0x196   : > { %v2364_v52 = vsel %vm1936_vm0, 1.0, %v2503_v5  ;;  %v1794_v60 = vpop.f32.mrf.mxu1 }
 0x197   : > { %v2410_v44 = vpop.f32.mrf.mxu0  ;;  %2032 = vst [vmem:[%s3731_s22 + $0x90] sm:$0xff] %v2364_v52  ;;  %v2096_v7 = vsel %vm1936_vm0, 0.0, %v2064_v42  ;;  %vm1934_vm1 = vcmp.gt.f32.partialorder %v1902_v26, 0.3  ;;  %v2062_v34 = vmul.f32 0.2, %v1902_v26  ;;  %v1905_v20 = vadd.f32 %v1873_v56, %v1803_v50 }
 0x198   : > { %v1736_v59 = vadd.f32 %v2410_v44, %v3650_v17  ;;  %v2362_v49 = vsel %vm1934_vm1, 1.0, %v2503_v5  ;;  %v1795_v10 = vadd.f32 %v3650_v17, %v1794_v60  ;;  %2128 = vst [vmem:[%s3746_s25 + $0x90] sm:$0xff] %v2096_v7 }
 0x199   : > { %v1727_v48 = vpop.f32.mrf.mxu0  ;;  %2030 = vst [vmem:[%s3731_s22 + $0x80] sm:$0xff] %v2362_v49  ;;  %v2094_v16 = vsel %vm1934_vm1, 0.0, %v2062_v34  ;;  %vm1937_vm2 = vcmp.gt.f32.partialorder %v1905_v20, 0.3  ;;  %v2065_v0 = vmul.f32 0.2, %v1905_v20 }
 0x19a   : > { %v1888_v58 = vadd.f32 %v1856_v57, %v1736_v59  ;;  %v1728_v39 = vadd.f32 %v3650_v17, %v1727_v48  ;;  %v2365_v2 = vsel %vm1937_vm2, 1.0, %v2503_v5  ;;  %v1903_v11 = vadd.f32 %v1871_v45, %v1795_v10  ;;  %2126 = vst [vmem:[%s3746_s25 + $0x80] sm:$0xff] %v2094_v16 }
 0x19b   : > { %v2411_v21 = vpop.f32.mrf.mxu0  ;;  %2033 = vst [vmem:[%s3731_s22 + $0x98] sm:$0xff] %v2365_v2  ;;  %v2097_v6 = vsel %vm1937_vm2, 0.0, %v2065_v0 }
 0x19c   : > { %vm1920_vm3 = vcmp.gt.f32.partialorder %v1888_v58, 0.3  ;;  %v2048_v31 = vmul.f32 0.2, %v1888_v58  ;;  %v1886_v22 = vadd.f32 %v1854_v4, %v1728_v39  ;;  %v1739_v1 = vadd.f32 %v2411_v21, %v3650_v17  ;;  %2129 = vst [vmem:[%s3746_s25 + $0x98] sm:$0xff] %v2097_v6 }
 0x19d   : > { %v2348_v63 = vsel %vm1920_vm3, 1.0, %v2503_v5  ;;  %v1730_v24 = vpop.f32.mrf.mxu0  ;;  %vm1935_vm4 = vcmp.gt.f32.partialorder %v1903_v11, 0.3  ;;  %v2063_v43 = vmul.f32 0.2, %v1903_v11 }
 0x19e   : > { %2016 = vst [vmem:[%s3731_s22 + $0x10] sm:$0xff] %v2348_v63  ;;  %v2080_v9 = vsel %vm1920_vm3, 0.0, %v2048_v31  ;;  %vm1918_vm5 = vcmp.gt.f32.partialorder %v1886_v22, 0.3  ;;  %v2046_v3 = vmul.f32 0.2, %v1886_v22  ;;  %v1889_v56 = vadd.f32 %v3664_v38, %v1739_v1 }
 0x19f   : > { %v2346_v33 = vsel %vm1918_vm5, 1.0, %v2503_v5  ;;  %v1731_v13 = vadd.f32 %v3650_v17, %v1730_v24  ;;  %v2363_v45 = vsel %vm1935_vm4, 1.0, %v2503_v5  ;;  %v2095_v55 = vsel %vm1935_vm4, 0.0, %v2063_v43  ;;  %2112 = vst [vmem:[%s3746_s25 + $0x10] sm:$0xff] %v2080_v9 }
 0x1a0   : > { %2014 = vst [vmem:[%s3731_s22] sm:$0xff] %v2346_v33  ;;  %v2078_v42 = vsel %vm1918_vm5, 0.0, %v2046_v3  ;;  %vm1921_vm6 = vcmp.gt.f32.partialorder %v1889_v56, 0.3  ;;  %v2049_v26 = vmul.f32 0.2, %v1889_v56  ;;  %2031 = vst [vmem:[%s3731_s22 + $0x88] sm:$0xff] %v2363_v45 }
 0x1a1   : > { %2127 = vst [vmem:[%s3746_s25 + $0x88] sm:$0xff] %v2095_v55  ;;  %v2349_v50 = vsel %vm1921_vm6, 1.0, %v2503_v5  ;;  %v1887_v38 = vadd.f32 %v3667_v8, %v1731_v13  ;;  %2110 = vst [vmem:[%s3746_s25] sm:$0xff] %v2078_v42 }
 0x1a2   : > { %2017 = vst [vmem:[%s3731_s22 + $0x18] sm:$0xff] %v2349_v50  ;;  %v2081_v57 = vsel %vm1921_vm6, 0.0, %v2049_v26 }
 0x1a3   : > { %vm1919_vm7 = vcmp.gt.f32.partialorder %v1887_v38, 0.3  ;;  %v2047_v52 = vmul.f32 0.2, %v1887_v38  ;;  %2113 = vst [vmem:[%s3746_s25 + $0x18] sm:$0xff] %v2081_v57 }
 0x1a4   : > { %v2347_v60 = vsel %vm1919_vm7, 1.0, %v2503_v5 }
 0x1a5   : > { %2015 = vst [vmem:[%s3731_s22 + $0x8] sm:$0xff] %v2347_v60  ;;  %v2079_v44 = vsel %vm1919_vm7, 0.0, %v2047_v52 }
 0x1a6   : > { %2111 = vst [vmem:[%s3746_s25 + $0x8] sm:$0xff] %v2079_v44 }
 0x1d0   : > { %v2430_v7 = vpop.f32.mrf.mxu1 }
 0x1d1   : > { %v1816_v4 = vadd.f32 %v2430_v7, %v3650_v17 }
 0x1d2   : > { %v1807_v34 = vpop.f32.mrf.mxu1 }
 0x1d3   : > { %v1908_v20 = vadd.f32 %v3674_v27, %v1816_v4  ;;  %v1808_v8 = vadd.f32 %v3650_v17, %v1807_v34 }
 0x1d4   : > { %v2431_v59 = vpop.f32.mrf.mxu1 }
 0x1d5   : > { %vm1940_vm8 = vcmp.gt.f32.partialorder %v1908_v20, 0.3  ;;  %v2068_v49 = vmul.f32 0.2, %v1908_v20  ;;  %v1906_v10 = vadd.f32 %v3680_v37, %v1808_v8  ;;  %v1819_v48 = vadd.f32 %v2431_v59, %v3650_v17 }
 0x1d6   : > { %v2368_v16 = vsel %vm1940_vm8, 1.0, %v2503_v5  ;;  %v1810_v0 = vpop.f32.mrf.mxu1 }
 0x1d7   : > { %v2414_v58 = vpop.f32.mrf.mxu0  ;;  %2036 = vst [vmem:[%s3731_s22 + $0xb0] sm:$0xff] %v2368_v16  ;;  %v2100_v39 = vsel %vm1940_vm8, 0.0, %v2068_v49  ;;  %vm1938_vm9 = vcmp.gt.f32.partialorder %v1906_v10, 0.3  ;;  %v2066_v27 = vmul.f32 0.2, %v1906_v10  ;;  %v1909_v2 = vadd.f32 %v3686_v53, %v1819_v48 }
 0x1d8   : > { %v1752_v11 = vadd.f32 %v2414_v58, %v3650_v17  ;;  %v2366_v21 = vsel %vm1938_vm9, 1.0, %v2503_v5  ;;  %v1811_v37 = vadd.f32 %v3650_v17, %v1810_v0  ;;  %2132 = vst [vmem:[%s3746_s25 + $0xb0] sm:$0xff] %v2100_v39 }
 0x1d9   : > { %v1743_v6 = vpop.f32.mrf.mxu0  ;;  %2034 = vst [vmem:[%s3731_s22 + $0xa0] sm:$0xff] %v2366_v21  ;;  %v2098_v31 = vsel %vm1938_vm9, 0.0, %v2066_v27  ;;  %vm1941_vm10 = vcmp.gt.f32.partialorder %v1909_v2, 0.3  ;;  %v2069_v22 = vmul.f32 0.2, %v1909_v2 }
 0x1da   : > { %v1892_v1 = vadd.f32 %v3671_v29, %v1752_v11  ;;  %v1744_v63 = vadd.f32 %v3650_v17, %v1743_v6  ;;  %v2369_v53 = vsel %vm1941_vm10, 1.0, %v2503_v5  ;;  %v1907_v24 = vadd.f32 %v3692_v62, %v1811_v37  ;;  %2130 = vst [vmem:[%s3746_s25 + $0xa0] sm:$0xff] %v2098_v31 }
 0x1db   : > { %v2415_v43 = vpop.f32.mrf.mxu0  ;;  %2037 = vst [vmem:[%s3731_s22 + $0xb8] sm:$0xff] %v2369_v53  ;;  %v2101_v9 = vsel %vm1941_vm10, 0.0, %v2069_v22 }
 0x1dc   : > { %vm1924_vm11 = vcmp.gt.f32.partialorder %v1892_v1, 0.3  ;;  %v2052_v3 = vmul.f32 0.2, %v1892_v1  ;;  %v1890_v56 = vadd.f32 %v3677_v41, %v1744_v63  ;;  %v1755_v33 = vadd.f32 %v2415_v43, %v3650_v17  ;;  %2133 = vst [vmem:[%s3746_s25 + $0xb8] sm:$0xff] %v2101_v9 }
 0x1dd   : > { %v2352_v29 = vsel %vm1924_vm11, 1.0, %v2503_v5  ;;  %v1746_v13 = vpop.f32.mrf.mxu0  ;;  %vm1939_vm12 = vcmp.gt.f32.partialorder %v1907_v24, 0.3  ;;  %v2067_v45 = vmul.f32 0.2, %v1907_v24 }
 0x1de   : > { %2020 = vst [vmem:[%s3731_s22 + $0x30] sm:$0xff] %v2352_v29  ;;  %v2084_v62 = vsel %vm1924_vm11, 0.0, %v2052_v3  ;;  %vm1922_vm13 = vcmp.gt.f32.partialorder %v1890_v56, 0.3  ;;  %v2050_v55 = vmul.f32 0.2, %v1890_v56  ;;  %v1893_v41 = vadd.f32 %v3683_v19, %v1755_v33 }
 0x1df   : > { %v2350_v42 = vsel %vm1922_vm13, 1.0, %v2503_v5  ;;  %v1747_v26 = vadd.f32 %v3650_v17, %v1746_v13  ;;  %v2367_v50 = vsel %vm1939_vm12, 1.0, %v2503_v5  ;;  %v2099_v38 = vsel %vm1939_vm12, 0.0, %v2067_v45  ;;  %2116 = vst [vmem:[%s3746_s25 + $0x30] sm:$0xff] %v2084_v62 }
 0x1e0   : > { %2018 = vst [vmem:[%s3731_s22 + $0x20] sm:$0xff] %v2350_v42  ;;  %v2082_v57 = vsel %vm1922_vm13, 0.0, %v2050_v55  ;;  %vm1925_vm14 = vcmp.gt.f32.partialorder %v1893_v41, 0.3  ;;  %v2053_v52 = vmul.f32 0.2, %v1893_v41 }
 0x1e1   : > { %2035 = vst [vmem:[%s3731_s22 + $0xa8] sm:$0xff] %v2367_v50  ;;  %2131 = vst [vmem:[%s3746_s25 + $0xa8] sm:$0xff] %v2099_v38  ;;  %v2353_v60 = vsel %vm1925_vm14, 1.0, %v2503_v5  ;;  %v1891_v19 = vadd.f32 %v3689_v32, %v1747_v26 }
 0x1e2   : > { %2114 = vst [vmem:[%s3746_s25 + $0x20] sm:$0xff] %v2082_v57  ;;  %2021 = vst [vmem:[%s3731_s22 + $0x38] sm:$0xff] %v2353_v60  ;;  %v2085_v44 = vsel %vm1925_vm14, 0.0, %v2053_v52 }
 0x1e3   : > { %vm1923_vm15 = vcmp.gt.f32.partialorder %v1891_v19, 0.3  ;;  %v2051_v7 = vmul.f32 0.2, %v1891_v19  ;;  %2117 = vst [vmem:[%s3746_s25 + $0x38] sm:$0xff] %v2085_v44 }
 0x1e4   : > { %v2351_v4 = vsel %vm1923_vm15, 1.0, %v2503_v5 }
 0x1e5   : > { %2019 = vst [vmem:[%s3731_s22 + $0x28] sm:$0xff] %v2351_v4  ;;  %v2083_v34 = vsel %vm1923_vm15, 0.0, %v2051_v7 }
 0x1e6   : > { %2115 = vst [vmem:[%s3746_s25 + $0x28] sm:$0xff] %v2083_v34 }
 0x210   : > { %v2434_v20 = vpop.f32.mrf.mxu1 }
 0x211   : > { %v1832_v8 = vadd.f32 %v2434_v20, %v3650_v17 }
 0x212   : > { %v1823_v59 = vpop.f32.mrf.mxu1 }
 0x213   : > { %v1912_v49 = vadd.f32 %v3698_v47, %v1832_v8  ;;  %v1824_v32 = vadd.f32 %v3650_v17, %v1823_v59 }
 0x214   : > { %v2435_v10 = vpop.f32.mrf.mxu1 }
 0x215   : > { %vm1944_vm0 = vcmp.gt.f32.partialorder %v1912_v49, 0.3  ;;  %v2072_v48 = vmul.f32 0.2, %v1912_v49  ;;  %v1910_v16 = vadd.f32 %v3704_v36, %v1824_v32  ;;  %v1835_v0 = vadd.f32 %v2435_v10, %v3650_v17 }
 0x216   : > { %v2372_v58 = vsel %vm1944_vm0, 1.0, %v2503_v5  ;;  %v1826_v39 = vpop.f32.mrf.mxu1 }
 0x217   : > { %v2418_v27 = vpop.f32.mrf.mxu0  ;;  %2040 = vst [vmem:[%s3731_s22 + $0xd0] sm:$0xff] %v2372_v58  ;;  %v2104_v2 = vsel %vm1944_vm0, 0.0, %v2072_v48  ;;  %vm1942_vm1 = vcmp.gt.f32.partialorder %v1910_v16, 0.3  ;;  %v2070_v47 = vmul.f32 0.2, %v1910_v16  ;;  %v1913_v11 = vadd.f32 %v3710_v61, %v1835_v0 }
 0x218   : > { %v1768_v21 = vadd.f32 %v2418_v27, %v3650_v17  ;;  %v2370_v37 = vsel %vm1942_vm1, 1.0, %v2503_v5  ;;  %v1827_v36 = vadd.f32 %v3650_v17, %v1826_v39  ;;  %2136 = vst [vmem:[%s3746_s25 + $0xd0] sm:$0xff] %v2104_v2 }
 0x219   : > { %v1759_v6 = vpop.f32.mrf.mxu0  ;;  %2038 = vst [vmem:[%s3731_s22 + $0xc0] sm:$0xff] %v2370_v37  ;;  %v2102_v31 = vsel %vm1942_vm1, 0.0, %v2070_v47  ;;  %vm1945_vm2 = vcmp.gt.f32.partialorder %v1913_v11, 0.3  ;;  %v2073_v22 = vmul.f32 0.2, %v1913_v11 }
 0x21a   : > { %v1896_v1 = vadd.f32 %v3695_v23, %v1768_v21  ;;  %v1760_v63 = vadd.f32 %v3650_v17, %v1759_v6  ;;  %v2373_v61 = vsel %vm1945_vm2, 1.0, %v2503_v5  ;;  %v1911_v53 = vadd.f32 %v3716_v30, %v1827_v36  ;;  %2134 = vst [vmem:[%s3746_s25 + $0xc0] sm:$0xff] %v2102_v31 }
 0x21b   : > { %v2419_v24 = vpop.f32.mrf.mxu0  ;;  %2041 = vst [vmem:[%s3731_s22 + $0xd8] sm:$0xff] %v2373_v61  ;;  %v2105_v43 = vsel %vm1945_vm2, 0.0, %v2073_v22 }
 0x21c   : > { %vm1928_vm3 = vcmp.gt.f32.partialorder %v1896_v1, 0.3  ;;  %v2056_v9 = vmul.f32 0.2, %v1896_v1  ;;  %v1894_v3 = vadd.f32 %v3701_v15, %v1760_v63  ;;  %v1771_v56 = vadd.f32 %v2419_v24, %v3650_v17  ;;  %2137 = vst [vmem:[%s3746_s25 + $0xd8] sm:$0xff] %v2105_v43 }
 0x21d   : > { %v2356_v23 = vsel %vm1928_vm3, 1.0, %v2503_v5  ;;  %v1762_v33 = vpop.f32.mrf.mxu0  ;;  %vm1943_vm4 = vcmp.gt.f32.partialorder %v1911_v53, 0.3  ;;  %v2071_v29 = vmul.f32 0.2, %v1911_v53 }
 0x21e   : > { %2024 = vst [vmem:[%s3731_s22 + $0x50] sm:$0xff] %v2356_v23  ;;  %v2088_v30 = vsel %vm1928_vm3, 0.0, %v2056_v9  ;;  %vm1926_vm5 = vcmp.gt.f32.partialorder %v1894_v3, 0.3  ;;  %v2054_v13 = vmul.f32 0.2, %v1894_v3  ;;  %v1897_v15 = vadd.f32 %v3707_v51, %v1771_v56 }
 0x21f   : > { %v2354_v45 = vsel %vm1926_vm5, 1.0, %v2503_v5  ;;  %v1763_v62 = vadd.f32 %v3650_v17, %v1762_v33  ;;  %v2371_v55 = vsel %vm1943_vm4, 1.0, %v2503_v5  ;;  %v2103_v41 = vsel %vm1943_vm4, 0.0, %v2071_v29  ;;  %2120 = vst [vmem:[%s3746_s25 + $0x50] sm:$0xff] %v2088_v30 }
 0x220   : > { %2022 = vst [vmem:[%s3731_s22 + $0x40] sm:$0xff] %v2354_v45  ;;  %v2086_v42 = vsel %vm1926_vm5, 0.0, %v2054_v13  ;;  %vm1929_vm6 = vcmp.gt.f32.partialorder %v1897_v15, 0.3  ;;  %v2057_v26 = vmul.f32 0.2, %v1897_v15 }
 0x221   : > { %2039 = vst [vmem:[%s3731_s22 + $0xc8] sm:$0xff] %v2371_v55  ;;  %2135 = vst [vmem:[%s3746_s25 + $0xc8] sm:$0xff] %v2103_v41  ;;  %v2357_v50 = vsel %vm1929_vm6, 1.0, %v2503_v5  ;;  %v1895_v51 = vadd.f32 %v3713_v12, %v1763_v62 }
 0x222   : > { %2118 = vst [vmem:[%s3746_s25 + $0x40] sm:$0xff] %v2086_v42  ;;  %2025 = vst [vmem:[%s3731_s22 + $0x58] sm:$0xff] %v2357_v50  ;;  %v2089_v38 = vsel %vm1929_vm6, 0.0, %v2057_v26 }
 0x223   : > { %vm1927_vm7 = vcmp.gt.f32.partialorder %v1895_v51, 0.3  ;;  %v2055_v57 = vmul.f32 0.2, %v1895_v51  ;;  %2121 = vst [vmem:[%s3746_s25 + $0x58] sm:$0xff] %v2089_v38 }
 0x224   : > { %v2355_v52 = vsel %vm1927_vm7, 1.0, %v2503_v5 }
 0x225   : > { %2023 = vst [vmem:[%s3731_s22 + $0x48] sm:$0xff] %v2355_v52  ;;  %v2087_v60 = vsel %vm1927_vm7, 0.0, %v2055_v57 }
 0x226   : > { %2119 = vst [vmem:[%s3746_s25 + $0x48] sm:$0xff] %v2087_v60 }
 0x24c   : > { %v2438_v19 = vpop.f32.mrf.mxu1 }
 0x24d   : > { %v1848_v44 = vadd.f32 %v2438_v19, %v3650_v17 }
 0x24e   : > { %v1839_v7 = vpop.f32.mrf.mxu1 }
 0x24f   : > { %v1916_v4 = vadd.f32 %v3722_v18, %v1848_v44  ;;  %v1840_v12 = vadd.f32 %v3650_v17, %v1839_v7 }
 0x250   : > { %v2439_v34 = vpop.f32.mrf.mxu1 }
 0x251   : > { %vm1948_vm8 = vcmp.gt.f32.partialorder %v1916_v4, 0.3  ;;  %v2076_v20 = vmul.f32 0.2, %v1916_v4  ;;  %v1914_v8 = vadd.f32 %v3734_v14, %v1840_v12  ;;  %v1851_v59 = vadd.f32 %v2439_v34, %v3650_v17 }
 0x252   : > { %v2376_v49 = vsel %vm1948_vm8, 1.0, %v2503_v5  ;;  %v1842_v32 = vpop.f32.mrf.mxu1 }
 0x253   : > { %v2422_v10 = vpop.f32.mrf.mxu0  ;;  %2044 = vst [vmem:[%s3731_s22 + $0xf0] sm:$0xff] %v2376_v49  ;;  %v2108_v48 = vsel %vm1948_vm8, 0.0, %v2076_v20  ;;  %vm1946_vm9 = vcmp.gt.f32.partialorder %v1914_v8, 0.3  ;;  %v2074_v18 = vmul.f32 0.2, %v1914_v8  ;;  %v1917_v16 = vadd.f32 %v3740_v40, %v1851_v59 }
 0x254   : > { %v1784_v0 = vadd.f32 %v2422_v10, %v3650_v17  ;;  %v2374_v58 = vsel %vm1946_vm9, 1.0, %v2503_v5  ;;  %v1843_v14 = vadd.f32 %v3650_v17, %v1842_v32  ;;  %2140 = vst [vmem:[%s3746_s25 + $0xf0] sm:$0xff] %v2108_v48 }
 0x255   : > { %v1775_v39 = vpop.f32.mrf.mxu0  ;;  %2042 = vst [vmem:[%s3731_s22 + $0xe0] sm:$0xff] %v2374_v58  ;;  %v2106_v27 = vsel %vm1946_vm9, 0.0, %v2074_v18  ;;  %vm1949_vm10 = vcmp.gt.f32.partialorder %v1917_v16, 0.3  ;;  %v2077_v2 = vmul.f32 0.2, %v1917_v16 }
 0x256   : > { %v1900_v47 = vadd.f32 %v3719_v25, %v1784_v0  ;;  %v1776_v11 = vadd.f32 %v3650_v17, %v1775_v39  ;;  %v2377_v40 = vsel %vm1949_vm10, 1.0, %v2503_v5  ;;  %v1915_v21 = vadd.f32 %v3753_v46, %v1843_v14  ;;  %2138 = vst [vmem:[%s3746_s25 + $0xe0] sm:$0xff] %v2106_v27 }
 0x257   : > { %v2423_v37 = vpop.f32.mrf.mxu0  ;;  %2045 = vst [vmem:[%s3731_s22 + $0xf8] sm:$0xff] %v2377_v40  ;;  %v2109_v36 = vsel %vm1949_vm10, 0.0, %v2077_v2 }
 0x258   : > { %vm1932_vm11 = vcmp.gt.f32.partialorder %v1900_v47, 0.3  ;;  %v2060_v6 = vmul.f32 0.2, %v1900_v47  ;;  %v1898_v31 = vadd.f32 %v3725_v35, %v1776_v11  ;;  %v1787_v22 = vadd.f32 %v2423_v37, %v3650_v17  ;;  %2141 = vst [vmem:[%s3746_s25 + $0xf8] sm:$0xff] %v2109_v36 }
 0x259   : > { %v2360_v25 = vsel %vm1932_vm11, 1.0, %v2503_v5  ;;  %v1778_v1 = vpop.f32.mrf.mxu0  ;;  %vm1947_vm12 = vcmp.gt.f32.partialorder %v1915_v21, 0.3  ;;  %v2075_v63 = vmul.f32 0.2, %v1915_v21 }
 0x25a   : > { %2028 = vst [vmem:[%s3731_s22 + $0x70] sm:$0xff] %v2360_v25  ;;  %v2092_v46 = vsel %vm1932_vm11, 0.0, %v2060_v6  ;;  %vm1930_vm13 = vcmp.gt.f32.partialorder %v1898_v31, 0.3  ;;  %v2058_v61 = vmul.f32 0.2, %v1898_v31  ;;  %v1901_v35 = vadd.f32 %v3737_v54, %v1787_v22 }
 0x25b   : > { %v2358_v53 = vsel %vm1930_vm13, 1.0, %v2503_v5  ;;  %v1779_v24 = vadd.f32 %v3650_v17, %v1778_v1  ;;  %v2375_v43 = vsel %vm1947_vm12, 1.0, %v2503_v5  ;;  %v2107_v9 = vsel %vm1947_vm12, 0.0, %v2075_v63  ;;  %2124 = vst [vmem:[%s3746_s25 + $0x70] sm:$0xff] %v2092_v46 }
 0x25c   : > { %2026 = vst [vmem:[%s3731_s22 + $0x60] sm:$0xff] %v2358_v53  ;;  %v2090_v3 = vsel %vm1930_vm13, 0.0, %v2058_v61  ;;  %vm1933_vm14 = vcmp.gt.f32.partialorder %v1901_v35, 0.3  ;;  %v2061_v56 = vmul.f32 0.2, %v1901_v35 }
 0x25d   : > { %2043 = vst [vmem:[%s3731_s22 + $0xe8] sm:$0xff] %v2375_v43  ;;  %2139 = vst [vmem:[%s3746_s25 + $0xe8] sm:$0xff] %v2107_v9  ;;  %v2361_v23 = vsel %vm1933_vm14, 1.0, %v2503_v5  ;;  %v1899_v54 = vadd.f32 %v3750_v28, %v1779_v24 }
 0x25e   : > { %2122 = vst [vmem:[%s3746_s25 + $0x60] sm:$0xff] %v2090_v3  ;;  %2029 = vst [vmem:[%s3731_s22 + $0x78] sm:$0xff] %v2361_v23  ;;  %v2093_v17 = vsel %vm1933_vm14, 0.0, %v2061_v56 }
 0x25f   : > { %vm1931_vm15 = vcmp.gt.f32.partialorder %v1899_v54, 0.3  ;;  %v2059_v33 = vmul.f32 0.2, %v1899_v54  ;;  %2125 = vst [vmem:[%s3746_s25 + $0x78] sm:$0xff] %v2093_v17 }
 0x260   : > { %v2359_v29 = vsel %vm1931_vm15, 1.0, %v2503_v5 }
 0x261   : > { %2027 = vst [vmem:[%s3731_s22 + $0x68] sm:$0xff] %v2359_v29  ;;  %v2091_v30 = vsel %vm1931_vm15, 0.0, %v2059_v33 }
 0x262   : > { %2123 = vst [vmem:[%s3746_s25 + $0x68] sm:$0xff] %v2091_v30 }
 0x263 PF: > { %s16_s18 = sadd.s32 1, %s2493_s18  }
 0x264   : > { %p13_p4 = scmp.ge.s32.totalorder %s16_s18, 4  }
 0x266   :  { %15 = sbr.rel (!%p13_p4) target bundleno = 1 (0x1), region = 81 }

</bundles_post_ra>
